<compile_context>
chip_gen: v6e
topology: v6e:2x2x1
jax: 0.10.0
libtpu: 0.0.40
codegen_flags: <defaults>
</compile_context>

<pallas_src>
import functools
import math

import jax
import jax.numpy as jnp
from jax import lax
from jax.experimental import pallas as pl
from jax.experimental.pallas import tpu as pltpu


def _layernorm(x, gamma, beta, eps=1e-6):
    mu = jnp.mean(x, axis=-1, keepdims=True)
    xc = x - mu
    var = jnp.mean(xc * xc, axis=-1, keepdims=True)
    return xc * lax.rsqrt(var + eps) * gamma + beta


def mha_kernel(*refs, block_b, lq, lk, lv, n_head, d_k, d_v,
               kv_fused, return_attn):
    it = iter(refs)
    q_ref = next(it)
    k_ref = next(it)
    v_ref = None if kv_fused else next(it)
    wq_ref = next(it)
    if kv_fused:
        wkv_ref = next(it)
    else:
        wk_ref = next(it)
        wv_ref = next(it)
    an_g_ref = next(it); an_b_ref = next(it)
    ffn_g_ref = next(it); ffn_b_ref = next(it)
    fc1_w_ref = next(it); fc1_b_ref = next(it)
    fc2_w_ref = next(it); fc2_b_ref = next(it)
    out_ref = next(it)
    attn_ref = next(it) if return_attn else None
    outv_ref = next(it)

    D = n_head * d_v
    dh_k = n_head * d_k
    nq = block_b * lq
    mm = wq_ref.dtype            # matmul dtype (bf16 when use_bf16_matmul)

    # --- residual + attn_norm in f32 on the flat (block_b*lq, D) rows ---
    qf = q_ref[...].astype(jnp.float32)
    qn = _layernorm(qf, an_g_ref[...], an_b_ref[...])

    # --- fused projections: one lane-dense MXU pass each (scale folded in wq) ---
    q_p = jnp.dot(qn.astype(mm), wq_ref[...],
                  preferred_element_type=jnp.float32)            # (nq, H*d_k)
    k_m = k_ref[...].astype(mm)
    if kv_fused:
        kv_p = jnp.dot(k_m, wkv_ref[...],
                       preferred_element_type=jnp.float32)       # (bk, H*(dk+dv))
        k_p = kv_p[:, :dh_k]
        v_p = kv_p[:, dh_k:]
    else:
        k_p = jnp.dot(k_m, wk_ref[...], preferred_element_type=jnp.float32)
        v_p = jnp.dot(v_ref[...].astype(mm), wv_ref[...],
                      preferred_element_type=jnp.float32)        # (bv, H*d_v)

    # out_v = W_v(v): written straight from the fused projection (lane-dense).
    outv_ref[...] = v_p.astype(outv_ref.dtype)

    q3 = q_p.reshape(block_b, lq, dh_k)
    k3 = k_p.reshape(block_b, lk, dh_k)
    v3 = v_p.reshape(block_b, lv, D)

    # --- per-head scaled-dot-product attention (tiny 3-D batched einsums) ---
    p_heads = []
    o_heads = []
    for h in range(n_head):
        qh = q3[:, :, h * d_k:(h + 1) * d_k]
        kh = k3[:, :, h * d_k:(h + 1) * d_k]
        vh = v3[:, :, h * d_v:(h + 1) * d_v]
        s = jnp.einsum("bqd,bkd->bqk", qh.astype(mm), kh.astype(mm),
                       preferred_element_type=jnp.float32)       # (bb, lq, lk)
        smax = jnp.max(s, axis=-1, keepdims=True)
        e = jnp.exp(s - smax)
        den = jnp.sum(e, axis=-1, keepdims=True)
        inv = pl.reciprocal(den, approx=True)        # EUP vrcp (free slot)
        inv = inv * (2.0 - den * inv)                # one Newton step -> ~f32 exact
        p = e * inv
        p_heads.append(p)
        o_heads.append(jnp.einsum("bqk,bkd->bqd", p.astype(mm), vh.astype(mm),
                                  preferred_element_type=jnp.float32))

    if return_attn:
        attn_ref[...] = jnp.concatenate(p_heads, axis=-1) \
            .reshape(nq, n_head * lk).astype(attn_ref.dtype)

    o = jnp.concatenate(o_heads, axis=-1).reshape(nq, D)

    # --- residual 1 ---
    x = o + qf

    # --- ff_norm + FeedForward (dropout = identity) + residual 2 ---
    xn = _layernorm(x, ffn_g_ref[...], ffn_b_ref[...])
    h1 = jnp.dot(xn.astype(mm), fc1_w_ref[...],
                 preferred_element_type=jnp.float32) + fc1_b_ref[...]
    h1 = jnp.maximum(h1, 0.0)
    h2 = jnp.dot(h1.astype(mm), fc2_w_ref[...],
                 preferred_element_type=jnp.float32) + fc2_b_ref[...]

    out_ref[...] = (h2 + x).astype(out_ref.dtype)


def _vmem_limit_bytes():
    phys = 64 * 1024 * 1024          # conservative default (v7x per-core VMEM)
    try:
        phys = int(pltpu.get_tpu_info().vmem_capacity_bytes)
    except Exception:
        pass
    # ~48 MiB on v7x (64 MiB physical), ~96 MiB on v5e / v6e (128 MiB physical)
    return min((phys * 3) // 4, 96 * 1024 * 1024)


def _auto_block_b(B, lq, lk, lv, D, n_head, d_k, hid, *, budget_bytes,
                  in_bytes, out_bytes, attn_bytes, kv_fused):
    """Per-batch-element VMEM footprint estimate (double-buffered I/O + live f32
    intermediates, incl. the (lq, hid) FFN activation and score/prob temps)."""
    f32 = 4
    per_b = (
        2 * in_bytes * (lq + lk + (0 if kv_fused else lv)) * D          # inputs
        + 2 * (out_bytes * lq * D + attn_bytes * lq * n_head * lk
               + out_bytes * lv * D)                                    # outputs
        + f32 * (6 * lq * D                       # qf/qn/x/xn/h2/o
                 + lq * hid                       # FFN hidden
                 + (lq + lk) * n_head * d_k       # Q/K projections
                 + lv * D                         # V projection
                 + 3 * lq * n_head * lk           # scores / exp / probs
                 + lq * D)
    )
    return int(max(1, min(B, 1024, budget_bytes // per_b)))


def multi_head_attention(q, k, v, params, *, n_head, d_k, d_v,
                         block_b=None, use_bf16_matmul=False,
                         return_attn=True, attn_dtype=jnp.float32):
    B, lq, D = q.shape
    lk = k.shape[1]
    kv_fused = v is k                 # identity-based fast path (same array for k/v)
    lv = lk if kv_fused else v.shape[1]
    hid = params["fc1_w"].shape[1]
    assert n_head * d_v == D
    out_dtype = q.dtype

    mm_dtype = jnp.bfloat16 if use_bf16_matmul else jnp.float32

    # --- host-side (free) weight prep: fold 1/sqrt(d_k) into wq, optional bf16 ---
    scale = 1.0 / (d_k ** 0.5)
    wq = (params["wq"] * scale).astype(mm_dtype)
    wk = params["wk"].astype(mm_dtype)
    wv = params["wv"].astype(mm_dtype)
    fc1_w = params["fc1_w"].astype(mm_dtype)
    fc2_w = params["fc2_w"].astype(mm_dtype)
    if kv_fused:
        weight_list = [wq, jnp.concatenate([wk, wv], axis=1)]
    else:
        weight_list = [wq, wk, wv]
    weight_list += [params["attn_norm_g"], params["attn_norm_b"],
                    params["ff_norm_g"], params["ff_norm_b"],
                    fc1_w, params["fc1_b"], fc2_w, params["fc2_b"]]

    # --- block size / VMEM budgeting (generation aware) ---
    vmem_limit = _vmem_limit_bytes()
    attn_bytes = jnp.dtype(attn_dtype).itemsize if return_attn else 0
    if block_b is None:
        block_b = _auto_block_b(
            B, lq, lk, lv, D, n_head, d_k, hid,
            budget_bytes=vmem_limit // 2,
            in_bytes=2 if use_bf16_matmul else jnp.dtype(q.dtype).itemsize,
            out_bytes=jnp.dtype(out_dtype).itemsize,
            attn_bytes=attn_bytes, kv_fused=kv_fused)
    block_b = int(max(1, min(block_b, B)))
    if B >= 2:                        # >= 2 grid blocks so both v7x TCs get work
        block_b = min(block_b, (B + 1) // 2)
    # second-minor (sublane) divisibility of the flattened (block_b*L, D) tiles
    granule = 16 if (use_bf16_matmul or attn_bytes == 2) else 8
    req = 1
    for L in (lq, lk, lv):
        g = granule // math.gcd(granule, L)
        req = req * g // math.gcd(req, g)
    block_b = max(req, (block_b // req) * req)

    num_blocks = int(pl.cdiv(B, block_b))
    Bp = num_blocks * block_b
    pad = Bp - B

    def _prep(x, L):
        if pad:
            x = jnp.pad(x, ((0, pad), (0, 0), (0, 0)))
        if use_bf16_matmul:
            x = x.astype(jnp.bfloat16)
        return x.reshape(Bp * L, D)   # flatten on host -> no in-kernel relayout

    seq_inputs = [_prep(q, lq), _prep(k, lk)]
    seq_specs = [pl.BlockSpec((block_b * lq, D), lambda b: (b, 0)),
                 pl.BlockSpec((block_b * lk, D), lambda b: (b, 0))]
    if not kv_fused:
        seq_inputs.append(_prep(v, lv))
        seq_specs.append(pl.BlockSpec((block_b * lv, D), lambda b: (b, 0)))

    weight_specs = [pl.BlockSpec(w.shape, (lambda b, n=w.ndim: (0,) * n))
                    for w in weight_list]

    out_shapes = [jax.ShapeDtypeStruct((Bp * lq, D), out_dtype)]
    out_specs = [pl.BlockSpec((block_b * lq, D), lambda b: (b, 0))]
    if return_attn:
        out_shapes.append(jax.ShapeDtypeStruct((Bp * lq, n_head * lk), attn_dtype))
        out_specs.append(pl.BlockSpec((block_b * lq, n_head * lk), lambda b: (b, 0)))
    out_shapes.append(jax.ShapeDtypeStruct((Bp * lv, D), out_dtype))
    out_specs.append(pl.BlockSpec((block_b * lv, D), lambda b: (b, 0)))

    kernel = functools.partial(
        mha_kernel, block_b=block_b, lq=lq, lk=lk, lv=lv,
        n_head=n_head, d_k=d_k, d_v=d_v,
        kv_fused=kv_fused, return_attn=return_attn)

    results = pl.pallas_call(
        kernel,
        out_shape=tuple(out_shapes),
        grid=(num_blocks,),
        in_specs=seq_specs + weight_specs,
        out_specs=tuple(out_specs),
        compiler_params=pltpu.CompilerParams(
            dimension_semantics=("parallel",),
            vmem_limit_bytes=int(vmem_limit)),
    )(*seq_inputs, *weight_list)

    out = results[0].reshape(Bp, lq, D)[:B]
    out_v = results[-1].reshape(Bp, lv, D)[:B]
    attn = None
    if return_attn:
        attn = results[1].reshape(Bp, lq, n_head, lk)[:B].transpose(0, 2, 1, 3)
        attn = attn.astype(jnp.float32)
    return out, attn, out_v


# ----------------------- pure-JAX reference (for checking) -----------------------
def reference_mha(q, k, v, params, *, n_head, d_k, d_v):
    B, Lq, D = q.shape
    Lk = k.shape[1]
    residual = q
    qn = _layernorm(q, params["attn_norm_g"], params["attn_norm_b"])
    Q = (qn @ params["wq"]).reshape(B, Lq, n_head, d_k).transpose(0, 2, 1, 3)
    K = (k @ params["wk"]).reshape(B, Lk, n_head, d_k).transpose(0, 2, 1, 3)
    Vfull = v @ params["wv"]
    V = Vfull.reshape(B, Lk, n_head, d_v).transpose(0, 2, 1, 3)
    scale = 1.0 / (d_k ** 0.5)
    s = jnp.einsum("bhqd,bhkd->bhqk", Q * scale, K)
    p = jax.nn.softmax(s, axis=-1)
    o = jnp.einsum("bhqk,bhkd->bhqd", p, V).transpose(0, 2, 1, 3).reshape(B, Lq, D)
    x = o + residual
    residual2 = x
    xn = _layernorm(x, params["ff_norm_g"], params["ff_norm_b"])
    h1 = jnp.maximum(xn @ params["fc1_w"] + params["fc1_b"], 0.0)
    h2 = h1 @ params["fc2_w"] + params["fc2_b"]
    return h2 + residual2, p, Vfull


if __name__ == "__main__":
    # Module hyperparameters (n_head * d_v == d_model required)
    n_head, d_model, d_k, d_v = 4, 32, 8, 8
    hid_dim = d_model * 4
    B, L = 10, 8   # B deliberately not a multiple of block_b in run 1 (padding path)

    key = jax.random.PRNGKey(0)
    keys = jax.random.split(key, 16)

    params = {
        "wq": jax.random.normal(keys[0], (d_model, n_head * d_k), jnp.float32) * 0.1,
        "wk": jax.random.normal(keys[1], (d_model, n_head * d_k), jnp.float32) * 0.1,
        "wv": jax.random.normal(keys[2], (d_model, n_head * d_v), jnp.float32) * 0.1,
        "attn_norm_g": jnp.ones((1, d_model), jnp.float32)
        + 0.05 * jax.random.normal(keys[3], (1, d_model), jnp.float32),
        "attn_norm_b": 0.05 * jax.random.normal(keys[4], (1, d_model), jnp.float32),
        "ff_norm_g": jnp.ones((1, d_model), jnp.float32)
        + 0.05 * jax.random.normal(keys[5], (1, d_model), jnp.float32),
        "ff_norm_b": 0.05 * jax.random.normal(keys[6], (1, d_model), jnp.float32),
        "fc1_w": jax.random.normal(keys[7], (d_model, hid_dim), jnp.float32) * 0.1,
        "fc1_b": 0.05 * jax.random.normal(keys[8], (1, hid_dim), jnp.float32),
        "fc2_w": jax.random.normal(keys[9], (hid_dim, d_model), jnp.float32) * 0.1,
        "fc2_b": 0.05 * jax.random.normal(keys[10], (1, d_model), jnp.float32),
    }

    q = jax.random.normal(keys[11], (B, L, d_model), jnp.float32)
    k = jax.random.normal(keys[12], (B, L, d_model), jnp.float32)
    v = jax.random.normal(keys[13], (B, L, d_model), jnp.float32)

    ref_out, ref_attn, ref_outv = reference_mha(
        q, k, v, params, n_head=n_head, d_k=d_k, d_v=d_v)

    # 1) f32 path, distinct k/v, explicit block_b=4 -> grid=(3,), batch padding exercised.
    out, attn, out_v = multi_head_attention(
        q, k, v, params, n_head=n_head, d_k=d_k, d_v=d_v, block_b=4)
    jax.block_until_ready((out, attn, out_v))
    assert jnp.allclose(out, ref_out, atol=1e-4, rtol=1e-4), "output mismatch (f32)"
    assert jnp.allclose(attn, ref_attn, atol=1e-4, rtol=1e-4), "attn mismatch (f32)"
    assert jnp.allclose(out_v, ref_outv, atol=1e-4, rtol=1e-4), "out_v mismatch (f32)"

    # 2) aliased k/v (v is k): fused K/V projection, single k/v input stream,
    #    auto block_b + generation-aware VMEM limit.
    r2_out, r2_attn, r2_outv = reference_mha(
        q, k, k, params, n_head=n_head, d_k=d_k, d_v=d_v)
    out2, attn2, out_v2 = multi_head_attention(
        q, k, k, params, n_head=n_head, d_k=d_k, d_v=d_v)
    jax.block_until_ready((out2, attn2, out_v2))
    assert jnp.allclose(out2, r2_out, atol=1e-4, rtol=1e-4), "output mismatch (kv-fused)"
    assert jnp.allclose(attn2, r2_attn, atol=1e-4, rtol=1e-4), "attn mismatch (kv-fused)"
    assert jnp.allclose(out_v2, r2_outv, atol=1e-4, rtol=1e-4), "out_v mismatch (kv-fused)"

    # 3) bf16 matmul path (weights + q/k/v in bf16, LN/softmax/residual f32) -
    #    loose tolerances, sanity check only.
    out3, attn3, out_v3 = multi_head_attention(
        q, k, v, params, n_head=n_head, d_k=d_k, d_v=d_v, use_bf16_matmul=True)
    jax.block_until_ready((out3, attn3, out_v3))
    assert jnp.allclose(out3, ref_out, atol=1.5e-1, rtol=5e-2), "output mismatch (bf16)"
    assert jnp.allclose(attn3, ref_attn, atol=5e-2, rtol=5e-2), "attn mismatch (bf16)"
    assert jnp.allclose(out_v3, ref_outv, atol=5e-2, rtol=5e-2), "out_v mismatch (bf16)"

    print("KERNEL_OK")
</pallas_src>

<mosaic_0001>
module attributes {stable_mosaic.version = 11 : i64} {
  func.func @mha_kernel(%arg0: i32, %arg1: memref<32x32xf32, #tpu.memory_space<vmem>>, %arg2: memref<32x32xf32, #tpu.memory_space<vmem>>, %arg3: memref<32x32xf32, #tpu.memory_space<vmem>>, %arg4: memref<32x32xf32, #tpu.memory_space<vmem>>, %arg5: memref<32x32xf32, #tpu.memory_space<vmem>>, %arg6: memref<32x32xf32, #tpu.memory_space<vmem>>, %arg7: memref<1x32xf32, #tpu.memory_space<vmem>>, %arg8: memref<1x32xf32, #tpu.memory_space<vmem>>, %arg9: memref<1x32xf32, #tpu.memory_space<vmem>>, %arg10: memref<1x32xf32, #tpu.memory_space<vmem>>, %arg11: memref<32x128xf32, #tpu.memory_space<vmem>>, %arg12: memref<1x128xf32, #tpu.memory_space<vmem>>, %arg13: memref<128x32xf32, #tpu.memory_space<vmem>>, %arg14: memref<1x32xf32, #tpu.memory_space<vmem>>, %arg15: memref<32x32xf32, #tpu.memory_space<vmem>>, %arg16: memref<32x32xf32, #tpu.memory_space<vmem>>, %arg17: memref<32x32xf32, #tpu.memory_space<vmem>>) attributes {dimension_semantics = [#tpu.dimension_semantics<parallel>], iteration_bounds = array<i64: 3>, scalar_prefetch = 0 : i64, scratch_operands = 0 : i64, tpu.core_type = #tpu.core_type<tc>, window_params = [{transform_indices = @transform_0, window_bounds = array<i64: 32, 32>}, {transform_indices = @transform_1, window_bounds = array<i64: 32, 32>}, {transform_indices = @transform_2, window_bounds = array<i64: 32, 32>}, {pipeline_mode = #tpu.pipeline_mode<synchronous>, transform_indices = @transform_3, window_bounds = array<i64: 32, 32>}, {pipeline_mode = #tpu.pipeline_mode<synchronous>, transform_indices = @transform_4, window_bounds = array<i64: 32, 32>}, {pipeline_mode = #tpu.pipeline_mode<synchronous>, transform_indices = @transform_5, window_bounds = array<i64: 32, 32>}, {pipeline_mode = #tpu.pipeline_mode<synchronous>, transform_indices = @transform_6, window_bounds = array<i64: 1, 32>}, {pipeline_mode = #tpu.pipeline_mode<synchronous>, transform_indices = @transform_7, window_bounds = array<i64: 1, 32>}, {pipeline_mode = #tpu.pipeline_mode<synchronous>, transform_indices = @transform_8, window_bounds = array<i64: 1, 32>}, {pipeline_mode = #tpu.pipeline_mode<synchronous>, transform_indices = @transform_9, window_bounds = array<i64: 1, 32>}, {pipeline_mode = #tpu.pipeline_mode<synchronous>, transform_indices = @transform_10, window_bounds = array<i64: 32, 128>}, {pipeline_mode = #tpu.pipeline_mode<synchronous>, transform_indices = @transform_11, window_bounds = array<i64: 1, 128>}, {pipeline_mode = #tpu.pipeline_mode<synchronous>, transform_indices = @transform_12, window_bounds = array<i64: 128, 32>}, {pipeline_mode = #tpu.pipeline_mode<synchronous>, transform_indices = @transform_13, window_bounds = array<i64: 1, 32>}, {transform_indices = @transform_14, window_bounds = array<i64: 32, 32>}, {transform_indices = @transform_15, window_bounds = array<i64: 32, 32>}, {transform_indices = @transform_16, window_bounds = array<i64: 32, 32>}]} {
    %c0 = arith.constant 0 : index
    %c0_0 = arith.constant 0 : index
    %0 = vector.load %arg1[%c0, %c0_0] : memref<32x32xf32, #tpu.memory_space<vmem>>, vector<32x32xf32>
    %c0_1 = arith.constant 0 : index
    %c0_2 = arith.constant 0 : index
    %1 = vector.load %arg7[%c0_1, %c0_2] : memref<1x32xf32, #tpu.memory_space<vmem>>, vector<1x32xf32>
    %c0_3 = arith.constant 0 : index
    %c0_4 = arith.constant 0 : index
    %2 = vector.load %arg8[%c0_3, %c0_4] : memref<1x32xf32, #tpu.memory_space<vmem>>, vector<1x32xf32>
    %cst = arith.constant dense<0.000000e+00> : vector<32xf32>
    %3 = vector.multi_reduction <add>, %0, %cst [1] : vector<32x32xf32> to vector<32xf32>
    %4 = vector.shape_cast %3 : vector<32xf32> to vector<32x1xf32>
    %cst_5 = arith.constant 3.200000e+01 : f32
    %5 = vector.broadcast %cst_5 : f32 to vector<32x1xf32>
    %6 = arith.divf %4, %5 : vector<32x1xf32>
    %7 = vector.broadcast %6 : vector<32x1xf32> to vector<32x32xf32>
    %8 = arith.subf %0, %7 : vector<32x32xf32>
    %9 = arith.mulf %8, %8 : vector<32x32xf32>
    %cst_6 = arith.constant dense<0.000000e+00> : vector<32xf32>
    %10 = vector.multi_reduction <add>, %9, %cst_6 [1] : vector<32x32xf32> to vector<32xf32>
    %11 = vector.shape_cast %10 : vector<32xf32> to vector<32x1xf32>
    %cst_7 = arith.constant 3.200000e+01 : f32
    %12 = vector.broadcast %cst_7 : f32 to vector<32x1xf32>
    %13 = arith.divf %11, %12 : vector<32x1xf32>
    %cst_8 = arith.constant 9.99999997E-7 : f32
    %14 = vector.broadcast %cst_8 : f32 to vector<32x1xf32>
    %15 = arith.addf %13, %14 : vector<32x1xf32>
    %16 = math.rsqrt %15 : vector<32x1xf32>
    %17 = vector.broadcast %16 : vector<32x1xf32> to vector<32x32xf32>
    %18 = arith.mulf %8, %17 : vector<32x32xf32>
    %19 = vector.broadcast %1 : vector<1x32xf32> to vector<32x32xf32>
    %20 = arith.mulf %18, %19 : vector<32x32xf32>
    %21 = vector.broadcast %2 : vector<1x32xf32> to vector<32x32xf32>
    %22 = arith.addf %20, %21 : vector<32x32xf32>
    %c0_9 = arith.constant 0 : index
    %c0_10 = arith.constant 0 : index
    %23 = vector.load %arg4[%c0_9, %c0_10] : memref<32x32xf32, #tpu.memory_space<vmem>>, vector<32x32xf32>
    %cst_11 = arith.constant dense<0.000000e+00> : vector<32x32xf32>
    %24 = tpu.matmul %22, %23, %cst_11 {dimension_numbers = #tpu.dot_dimension_numbers<[1], [0], [0], [1], [0, 0, 1, 1], [], []>} : vector<32x32xf32>, vector<32x32xf32>, vector<32x32xf32> -> vector<32x32xf32>
    %c0_12 = arith.constant 0 : index
    %c0_13 = arith.constant 0 : index
    %25 = vector.load %arg2[%c0_12, %c0_13] : memref<32x32xf32, #tpu.memory_space<vmem>>, vector<32x32xf32>
    %c0_14 = arith.constant 0 : index
    %c0_15 = arith.constant 0 : index
    %26 = vector.load %arg5[%c0_14, %c0_15] : memref<32x32xf32, #tpu.memory_space<vmem>>, vector<32x32xf32>
    %cst_16 = arith.constant dense<0.000000e+00> : vector<32x32xf32>
    %27 = tpu.matmul %25, %26, %cst_16 {dimension_numbers = #tpu.dot_dimension_numbers<[1], [0], [0], [1], [0, 0, 1, 1], [], []>} : vector<32x32xf32>, vector<32x32xf32>, vector<32x32xf32> -> vector<32x32xf32>
    %c0_17 = arith.constant 0 : index
    %c0_18 = arith.constant 0 : index
    %28 = vector.load %arg3[%c0_17, %c0_18] : memref<32x32xf32, #tpu.memory_space<vmem>>, vector<32x32xf32>
    %c0_19 = arith.constant 0 : index
    %c0_20 = arith.constant 0 : index
    %29 = vector.load %arg6[%c0_19, %c0_20] : memref<32x32xf32, #tpu.memory_space<vmem>>, vector<32x32xf32>
    %cst_21 = arith.constant dense<0.000000e+00> : vector<32x32xf32>
    %30 = tpu.matmul %28, %29, %cst_21 {dimension_numbers = #tpu.dot_dimension_numbers<[1], [0], [0], [1], [0, 0, 1, 1], [], []>} : vector<32x32xf32>, vector<32x32xf32>, vector<32x32xf32> -> vector<32x32xf32>
    %c0_22 = arith.constant 0 : index
    %c0_23 = arith.constant 0 : index
    %31 = vector.load %arg17[%c0_22, %c0_23] : memref<32x32xf32, #tpu.memory_space<vmem>>, vector<32x32xf32>
    tpu.vector_store %arg17[%c0_22, %c0_23], %30 {strides = array<i32>} : memref<32x32xf32, #tpu.memory_space<vmem>>, vector<32x32xf32>,
    %32 = vector.shape_cast %24 : vector<32x32xf32> to vector<4x8x32xf32>
    %33 = vector.shape_cast %27 : vector<32x32xf32> to vector<4x8x32xf32>
    %34 = vector.shape_cast %30 : vector<32x32xf32> to vector<4x8x32xf32>
    %35 = vector.extract_strided_slice %32 {offsets = [0, 0, 0], sizes = [4, 8, 8], strides = [1, 1, 1]} : vector<4x8x32xf32> to vector<4x8x8xf32>
    %36 = vector.extract_strided_slice %33 {offsets = [0, 0, 0], sizes = [4, 8, 8], strides = [1, 1, 1]} : vector<4x8x32xf32> to vector<4x8x8xf32>
    %37 = vector.extract_strided_slice %34 {offsets = [0, 0, 0], sizes = [4, 8, 8], strides = [1, 1, 1]} : vector<4x8x32xf32> to vector<4x8x8xf32>
    "tpu.trace_start"() <{level = 10 : i32, message = "bqd,bkd->bqk"}> : () -> ()
    %cst_24 = arith.constant dense<0.000000e+00> : vector<4x8x8xf32>
    %38 = tpu.matmul %35, %36, %cst_24 {dimension_numbers = #tpu.dot_dimension_numbers<[2], [2], [1], [1], [0, 0, 0, 1, 1, 1], [0], [0]>} : vector<4x8x8xf32>, vector<4x8x8xf32>, vector<4x8x8xf32> -> vector<4x8x8xf32>
    "tpu.trace_stop"() : () -> ()
    %cst_25 = arith.constant dense<0xFF800000> : vector<4x8xf32>
    %39 = vector.multi_reduction <maximumf>, %38, %cst_25 [2] : vector<4x8x8xf32> to vector<4x8xf32>
    %40 = vector.shape_cast %39 : vector<4x8xf32> to vector<4x8x1xf32>
    %41 = vector.broadcast %40 : vector<4x8x1xf32> to vector<4x8x8xf32>
    %42 = arith.subf %38, %41 : vector<4x8x8xf32>
    %43 = math.exp %42 : vector<4x8x8xf32>
    %cst_26 = arith.constant dense<0.000000e+00> : vector<4x8xf32>
    %44 = vector.multi_reduction <add>, %43, %cst_26 [2] : vector<4x8x8xf32> to vector<4x8xf32>
    %45 = vector.shape_cast %44 : vector<4x8xf32> to vector<4x8x1xf32>
    %46 = tpu.reciprocal %45 {approx = true} : vector<4x8x1xf32> -> vector<4x8x1xf32>
    %47 = arith.mulf %45, %46 : vector<4x8x1xf32>
    %cst_27 = arith.constant 2.000000e+00 : f32
    %48 = vector.broadcast %cst_27 : f32 to vector<4x8x1xf32>
    %49 = arith.subf %48, %47 : vector<4x8x1xf32>
    %50 = arith.mulf %46, %49 : vector<4x8x1xf32>
    %51 = vector.broadcast %50 : vector<4x8x1xf32> to vector<4x8x8xf32>
    %52 = arith.mulf %43, %51 : vector<4x8x8xf32>
    "tpu.trace_start"() <{level = 10 : i32, message = "bqk,bkd->bqd"}> : () -> ()
    %cst_28 = arith.constant dense<0.000000e+00> : vector<4x8x8xf32>
    %53 = tpu.matmul %52, %37, %cst_28 {dimension_numbers = #tpu.dot_dimension_numbers<[2], [1], [1], [2], [0, 0, 0, 1, 1, 2], [0], [0]>} : vector<4x8x8xf32>, vector<4x8x8xf32>, vector<4x8x8xf32> -> vector<4x8x8xf32>
    "tpu.trace_stop"() : () -> ()
    %54 = vector.extract_strided_slice %32 {offsets = [0, 0, 8], sizes = [4, 8, 8], strides = [1, 1, 1]} : vector<4x8x32xf32> to vector<4x8x8xf32>
    %55 = vector.extract_strided_slice %33 {offsets = [0, 0, 8], sizes = [4, 8, 8], strides = [1, 1, 1]} : vector<4x8x32xf32> to vector<4x8x8xf32>
    %56 = vector.extract_strided_slice %34 {offsets = [0, 0, 8], sizes = [4, 8, 8], strides = [1, 1, 1]} : vector<4x8x32xf32> to vector<4x8x8xf32>
    "tpu.trace_start"() <{level = 10 : i32, message = "bqd,bkd->bqk"}> : () -> ()
    %cst_29 = arith.constant dense<0.000000e+00> : vector<4x8x8xf32>
    %57 = tpu.matmul %54, %55, %cst_29 {dimension_numbers = #tpu.dot_dimension_numbers<[2], [2], [1], [1], [0, 0, 0, 1, 1, 1], [0], [0]>} : vector<4x8x8xf32>, vector<4x8x8xf32>, vector<4x8x8xf32> -> vector<4x8x8xf32>
    "tpu.trace_stop"() : () -> ()
    %cst_30 = arith.constant dense<0xFF800000> : vector<4x8xf32>
    %58 = vector.multi_reduction <maximumf>, %57, %cst_30 [2] : vector<4x8x8xf32> to vector<4x8xf32>
    %59 = vector.shape_cast %58 : vector<4x8xf32> to vector<4x8x1xf32>
    %60 = vector.broadcast %59 : vector<4x8x1xf32> to vector<4x8x8xf32>
    %61 = arith.subf %57, %60 : vector<4x8x8xf32>
    %62 = math.exp %61 : vector<4x8x8xf32>
    %cst_31 = arith.constant dense<0.000000e+00> : vector<4x8xf32>
    %63 = vector.multi_reduction <add>, %62, %cst_31 [2] : vector<4x8x8xf32> to vector<4x8xf32>
    %64 = vector.shape_cast %63 : vector<4x8xf32> to vector<4x8x1xf32>
    %65 = tpu.reciprocal %64 {approx = true} : vector<4x8x1xf32> -> vector<4x8x1xf32>
    %66 = arith.mulf %64, %65 : vector<4x8x1xf32>
    %cst_32 = arith.constant 2.000000e+00 : f32
    %67 = vector.broadcast %cst_32 : f32 to vector<4x8x1xf32>
    %68 = arith.subf %67, %66 : vector<4x8x1xf32>
    %69 = arith.mulf %65, %68 : vector<4x8x1xf32>
    %70 = vector.broadcast %69 : vector<4x8x1xf32> to vector<4x8x8xf32>
    %71 = arith.mulf %62, %70 : vector<4x8x8xf32>
    "tpu.trace_start"() <{level = 10 : i32, message = "bqk,bkd->bqd"}> : () -> ()
    %cst_33 = arith.constant dense<0.000000e+00> : vector<4x8x8xf32>
    %72 = tpu.matmul %71, %56, %cst_33 {dimension_numbers = #tpu.dot_dimension_numbers<[2], [1], [1], [2], [0, 0, 0, 1, 1, 2], [0], [0]>} : vector<4x8x8xf32>, vector<4x8x8xf32>, vector<4x8x8xf32> -> vector<4x8x8xf32>
    "tpu.trace_stop"() : () -> ()
    %73 = vector.extract_strided_slice %32 {offsets = [0, 0, 16], sizes = [4, 8, 8], strides = [1, 1, 1]} : vector<4x8x32xf32> to vector<4x8x8xf32>
    %74 = vector.extract_strided_slice %33 {offsets = [0, 0, 16], sizes = [4, 8, 8], strides = [1, 1, 1]} : vector<4x8x32xf32> to vector<4x8x8xf32>
    %75 = vector.extract_strided_slice %34 {offsets = [0, 0, 16], sizes = [4, 8, 8], strides = [1, 1, 1]} : vector<4x8x32xf32> to vector<4x8x8xf32>
    "tpu.trace_start"() <{level = 10 : i32, message = "bqd,bkd->bqk"}> : () -> ()
    %cst_34 = arith.constant dense<0.000000e+00> : vector<4x8x8xf32>
    %76 = tpu.matmul %73, %74, %cst_34 {dimension_numbers = #tpu.dot_dimension_numbers<[2], [2], [1], [1], [0, 0, 0, 1, 1, 1], [0], [0]>} : vector<4x8x8xf32>, vector<4x8x8xf32>, vector<4x8x8xf32> -> vector<4x8x8xf32>
    "tpu.trace_stop"() : () -> ()
    %cst_35 = arith.constant dense<0xFF800000> : vector<4x8xf32>
    %77 = vector.multi_reduction <maximumf>, %76, %cst_35 [2] : vector<4x8x8xf32> to vector<4x8xf32>
    %78 = vector.shape_cast %77 : vector<4x8xf32> to vector<4x8x1xf32>
    %79 = vector.broadcast %78 : vector<4x8x1xf32> to vector<4x8x8xf32>
    %80 = arith.subf %76, %79 : vector<4x8x8xf32>
    %81 = math.exp %80 : vector<4x8x8xf32>
    %cst_36 = arith.constant dense<0.000000e+00> : vector<4x8xf32>
    %82 = vector.multi_reduction <add>, %81, %cst_36 [2] : vector<4x8x8xf32> to vector<4x8xf32>
    %83 = vector.shape_cast %82 : vector<4x8xf32> to vector<4x8x1xf32>
    %84 = tpu.reciprocal %83 {approx = true} : vector<4x8x1xf32> -> vector<4x8x1xf32>
    %85 = arith.mulf %83, %84 : vector<4x8x1xf32>
    %cst_37 = arith.constant 2.000000e+00 : f32
    %86 = vector.broadcast %cst_37 : f32 to vector<4x8x1xf32>
    %87 = arith.subf %86, %85 : vector<4x8x1xf32>
    %88 = arith.mulf %84, %87 : vector<4x8x1xf32>
    %89 = vector.broadcast %88 : vector<4x8x1xf32> to vector<4x8x8xf32>
    %90 = arith.mulf %81, %89 : vector<4x8x8xf32>
    "tpu.trace_start"() <{level = 10 : i32, message = "bqk,bkd->bqd"}> : () -> ()
    %cst_38 = arith.constant dense<0.000000e+00> : vector<4x8x8xf32>
    %91 = tpu.matmul %90, %75, %cst_38 {dimension_numbers = #tpu.dot_dimension_numbers<[2], [1], [1], [2], [0, 0, 0, 1, 1, 2], [0], [0]>} : vector<4x8x8xf32>, vector<4x8x8xf32>, vector<4x8x8xf32> -> vector<4x8x8xf32>
    "tpu.trace_stop"() : () -> ()
    %92 = vector.extract_strided_slice %32 {offsets = [0, 0, 24], sizes = [4, 8, 8], strides = [1, 1, 1]} : vector<4x8x32xf32> to vector<4x8x8xf32>
    %93 = vector.extract_strided_slice %33 {offsets = [0, 0, 24], sizes = [4, 8, 8], strides = [1, 1, 1]} : vector<4x8x32xf32> to vector<4x8x8xf32>
    %94 = vector.extract_strided_slice %34 {offsets = [0, 0, 24], sizes = [4, 8, 8], strides = [1, 1, 1]} : vector<4x8x32xf32> to vector<4x8x8xf32>
    "tpu.trace_start"() <{level = 10 : i32, message = "bqd,bkd->bqk"}> : () -> ()
    %cst_39 = arith.constant dense<0.000000e+00> : vector<4x8x8xf32>
    %95 = tpu.matmul %92, %93, %cst_39 {dimension_numbers = #tpu.dot_dimension_numbers<[2], [2], [1], [1], [0, 0, 0, 1, 1, 1], [0], [0]>} : vector<4x8x8xf32>, vector<4x8x8xf32>, vector<4x8x8xf32> -> vector<4x8x8xf32>
    "tpu.trace_stop"() : () -> ()
    %cst_40 = arith.constant dense<0xFF800000> : vector<4x8xf32>
    %96 = vector.multi_reduction <maximumf>, %95, %cst_40 [2] : vector<4x8x8xf32> to vector<4x8xf32>
    %97 = vector.shape_cast %96 : vector<4x8xf32> to vector<4x8x1xf32>
    %98 = vector.broadcast %97 : vector<4x8x1xf32> to vector<4x8x8xf32>
    %99 = arith.subf %95, %98 : vector<4x8x8xf32>
    %100 = math.exp %99 : vector<4x8x8xf32>
    %cst_41 = arith.constant dense<0.000000e+00> : vector<4x8xf32>
    %101 = vector.multi_reduction <add>, %100, %cst_41 [2] : vector<4x8x8xf32> to vector<4x8xf32>
    %102 = vector.shape_cast %101 : vector<4x8xf32> to vector<4x8x1xf32>
    %103 = tpu.reciprocal %102 {approx = true} : vector<4x8x1xf32> -> vector<4x8x1xf32>
    %104 = arith.mulf %102, %103 : vector<4x8x1xf32>
    %cst_42 = arith.constant 2.000000e+00 : f32
    %105 = vector.broadcast %cst_42 : f32 to vector<4x8x1xf32>
    %106 = arith.subf %105, %104 : vector<4x8x1xf32>
    %107 = arith.mulf %103, %106 : vector<4x8x1xf32>
    %108 = vector.broadcast %107 : vector<4x8x1xf32> to vector<4x8x8xf32>
    %109 = arith.mulf %100, %108 : vector<4x8x8xf32>
    "tpu.trace_start"() <{level = 10 : i32, message = "bqk,bkd->bqd"}> : () -> ()
    %cst_43 = arith.constant dense<0.000000e+00> : vector<4x8x8xf32>
    %110 = tpu.matmul %109, %94, %cst_43 {dimension_numbers = #tpu.dot_dimension_numbers<[2], [1], [1], [2], [0, 0, 0, 1, 1, 2], [0], [0]>} : vector<4x8x8xf32>, vector<4x8x8xf32>, vector<4x8x8xf32> -> vector<4x8x8xf32>
    "tpu.trace_stop"() : () -> ()
    %111 = tpu.concatenate %52, %71, %90, %109 in 2 : vector<4x8x8xf32>, vector<4x8x8xf32>, vector<4x8x8xf32>, vector<4x8x8xf32> -> vector<4x8x32xf32>
    %112 = vector.shape_cast %111 : vector<4x8x32xf32> to vector<32x32xf32>
    %c0_44 = arith.constant 0 : index
    %c0_45 = arith.constant 0 : index
    %113 = vector.load %arg16[%c0_44, %c0_45] : memref<32x32xf32, #tpu.memory_space<vmem>>, vector<32x32xf32>
    tpu.vector_store %arg16[%c0_44, %c0_45], %112 {strides = array<i32>} : memref<32x32xf32, #tpu.memory_space<vmem>>, vector<32x32xf32>,
    %114 = tpu.concatenate %53, %72, %91, %110 in 2 : vector<4x8x8xf32>, vector<4x8x8xf32>, vector<4x8x8xf32>, vector<4x8x8xf32> -> vector<4x8x32xf32>
    %115 = vector.shape_cast %114 : vector<4x8x32xf32> to vector<32x32xf32>
    %116 = arith.addf %115, %0 : vector<32x32xf32>
    %c0_46 = arith.constant 0 : index
    %c0_47 = arith.constant 0 : index
    %117 = vector.load %arg9[%c0_46, %c0_47] : memref<1x32xf32, #tpu.memory_space<vmem>>, vector<1x32xf32>
    %c0_48 = arith.constant 0 : index
    %c0_49 = arith.constant 0 : index
    %118 = vector.load %arg10[%c0_48, %c0_49] : memref<1x32xf32, #tpu.memory_space<vmem>>, vector<1x32xf32>
    %cst_50 = arith.constant dense<0.000000e+00> : vector<32xf32>
    %119 = vector.multi_reduction <add>, %116, %cst_50 [1] : vector<32x32xf32> to vector<32xf32>
    %120 = vector.shape_cast %119 : vector<32xf32> to vector<32x1xf32>
    %cst_51 = arith.constant 3.200000e+01 : f32
    %121 = vector.broadcast %cst_51 : f32 to vector<32x1xf32>
    %122 = arith.divf %120, %121 : vector<32x1xf32>
    %123 = vector.broadcast %122 : vector<32x1xf32> to vector<32x32xf32>
    %124 = arith.subf %116, %123 : vector<32x32xf32>
    %125 = arith.mulf %124, %124 : vector<32x32xf32>
    %cst_52 = arith.constant dense<0.000000e+00> : vector<32xf32>
    %126 = vector.multi_reduction <add>, %125, %cst_52 [1] : vector<32x32xf32> to vector<32xf32>
    %127 = vector.shape_cast %126 : vector<32xf32> to vector<32x1xf32>
    %cst_53 = arith.constant 3.200000e+01 : f32
    %128 = vector.broadcast %cst_53 : f32 to vector<32x1xf32>
    %129 = arith.divf %127, %128 : vector<32x1xf32>
    %cst_54 = arith.constant 9.99999997E-7 : f32
    %130 = vector.broadcast %cst_54 : f32 to vector<32x1xf32>
    %131 = arith.addf %129, %130 : vector<32x1xf32>
    %132 = math.rsqrt %131 : vector<32x1xf32>
    %133 = vector.broadcast %132 : vector<32x1xf32> to vector<32x32xf32>
    %134 = arith.mulf %124, %133 : vector<32x32xf32>
    %135 = vector.broadcast %117 : vector<1x32xf32> to vector<32x32xf32>
    %136 = arith.mulf %134, %135 : vector<32x32xf32>
    %137 = vector.broadcast %118 : vector<1x32xf32> to vector<32x32xf32>
    %138 = arith.addf %136, %137 : vector<32x32xf32>
    %c0_55 = arith.constant 0 : index
    %c0_56 = arith.constant 0 : index
    %139 = vector.load %arg11[%c0_55, %c0_56] : memref<32x128xf32, #tpu.memory_space<vmem>>, vector<32x128xf32>
    %cst_57 = arith.constant dense<0.000000e+00> : vector<32x128xf32>
    %140 = tpu.matmul %138, %139, %cst_57 {dimension_numbers = #tpu.dot_dimension_numbers<[1], [0], [0], [1], [0, 0, 1, 1], [], []>} : vector<32x32xf32>, vector<32x128xf32>, vector<32x128xf32> -> vector<32x128xf32>
    %c0_58 = arith.constant 0 : index
    %c0_59 = arith.constant 0 : index
    %141 = vector.load %arg12[%c0_58, %c0_59] : memref<1x128xf32, #tpu.memory_space<vmem>>, vector<1x128xf32>
    %142 = vector.broadcast %141 : vector<1x128xf32> to vector<32x128xf32>
    %143 = arith.addf %140, %142 : vector<32x128xf32>
    %cst_60 = arith.constant 0.000000e+00 : f32
    %144 = vector.broadcast %cst_60 : f32 to vector<32x128xf32>
    %145 = arith.maximumf %143, %144 : vector<32x128xf32>
    %c0_61 = arith.constant 0 : index
    %c0_62 = arith.constant 0 : index
    %146 = vector.load %arg13[%c0_61, %c0_62] : memref<128x32xf32, #tpu.memory_space<vmem>>, vector<128x32xf32>
    %cst_63 = arith.constant dense<0.000000e+00> : vector<32x32xf32>
    %147 = tpu.matmul %145, %146, %cst_63 {dimension_numbers = #tpu.dot_dimension_numbers<[1], [0], [0], [1], [0, 0, 1, 1], [], []>} : vector<32x128xf32>, vector<128x32xf32>, vector<32x32xf32> -> vector<32x32xf32>
    %c0_64 = arith.constant 0 : index
    %c0_65 = arith.constant 0 : index
    %148 = vector.load %arg14[%c0_64, %c0_65] : memref<1x32xf32, #tpu.memory_space<vmem>>, vector<1x32xf32>
    %149 = vector.broadcast %148 : vector<1x32xf32> to vector<32x32xf32>
    %150 = arith.addf %147, %149 : vector<32x32xf32>
    %151 = arith.addf %150, %116 : vector<32x32xf32>
    %c0_66 = arith.constant 0 : index
    %c0_67 = arith.constant 0 : index
    %152 = vector.load %arg15[%c0_66, %c0_67] : memref<32x32xf32, #tpu.memory_space<vmem>>, vector<32x32xf32>
    tpu.vector_store %arg15[%c0_66, %c0_67], %151 {strides = array<i32>} : memref<32x32xf32, #tpu.memory_space<vmem>>, vector<32x32xf32>,
    return
  }
  func.func @transform_0(%arg0: i32) -> (i32, i32) {
    %c0_i32 = arith.constant 0 : i32
    %c0_i32_0 = arith.constant 0 : i32
    return %arg0, %c0_i32 : i32, i32
  }
  func.func @transform_1(%arg0: i32) -> (i32, i32) {
    %c0_i32 = arith.constant 0 : i32
    %c0_i32_0 = arith.constant 0 : i32
    return %arg0, %c0_i32 : i32, i32
  }
  func.func @transform_2(%arg0: i32) -> (i32, i32) {
    %c0_i32 = arith.constant 0 : i32
    %c0_i32_0 = arith.constant 0 : i32
    return %arg0, %c0_i32 : i32, i32
  }
  func.func @transform_3(%arg0: i32) -> (i32, i32) {
    %c0_i32 = arith.constant 0 : i32
    %c0_i32_0 = arith.constant 0 : i32
    %c0_i32_1 = arith.constant 0 : i32
    return %c0_i32, %c0_i32_0 : i32, i32
  }
  func.func @transform_4(%arg0: i32) -> (i32, i32) {
    %c0_i32 = arith.constant 0 : i32
    %c0_i32_0 = arith.constant 0 : i32
    %c0_i32_1 = arith.constant 0 : i32
    return %c0_i32, %c0_i32_0 : i32, i32
  }
  func.func @transform_5(%arg0: i32) -> (i32, i32) {
    %c0_i32 = arith.constant 0 : i32
    %c0_i32_0 = arith.constant 0 : i32
    %c0_i32_1 = arith.constant 0 : i32
    return %c0_i32, %c0_i32_0 : i32, i32
  }
  func.func @transform_6(%arg0: i32) -> (i32, i32) {
    %c0_i32 = arith.constant 0 : i32
    %c0_i32_0 = arith.constant 0 : i32
    %c0_i32_1 = arith.constant 0 : i32
    return %c0_i32, %c0_i32_0 : i32, i32
  }
  func.func @transform_7(%arg0: i32) -> (i32, i32) {
    %c0_i32 = arith.constant 0 : i32
    %c0_i32_0 = arith.constant 0 : i32
    %c0_i32_1 = arith.constant 0 : i32
    return %c0_i32, %c0_i32_0 : i32, i32
  }
  func.func @transform_8(%arg0: i32) -> (i32, i32) {
    %c0_i32 = arith.constant 0 : i32
    %c0_i32_0 = arith.constant 0 : i32
    %c0_i32_1 = arith.constant 0 : i32
    return %c0_i32, %c0_i32_0 : i32, i32
  }
  func.func @transform_9(%arg0: i32) -> (i32, i32) {
    %c0_i32 = arith.constant 0 : i32
    %c0_i32_0 = arith.constant 0 : i32
    %c0_i32_1 = arith.constant 0 : i32
    return %c0_i32, %c0_i32_0 : i32, i32
  }
  func.func @transform_10(%arg0: i32) -> (i32, i32) {
    %c0_i32 = arith.constant 0 : i32
    %c0_i32_0 = arith.constant 0 : i32
    %c0_i32_1 = arith.constant 0 : i32
    return %c0_i32, %c0_i32_0 : i32, i32
  }
  func.func @transform_11(%arg0: i32) -> (i32, i32) {
    %c0_i32 = arith.constant 0 : i32
    %c0_i32_0 = arith.constant 0 : i32
    %c0_i32_1 = arith.constant 0 : i32
    return %c0_i32, %c0_i32_0 : i32, i32
  }
  func.func @transform_12(%arg0: i32) -> (i32, i32) {
    %c0_i32 = arith.constant 0 : i32
    %c0_i32_0 = arith.constant 0 : i32
    %c0_i32_1 = arith.constant 0 : i32
    return %c0_i32, %c0_i32_0 : i32, i32
  }
  func.func @transform_13(%arg0: i32) -> (i32, i32) {
    %c0_i32 = arith.constant 0 : i32
    %c0_i32_0 = arith.constant 0 : i32
    %c0_i32_1 = arith.constant 0 : i32
    return %c0_i32, %c0_i32_0 : i32, i32
  }
  func.func @transform_14(%arg0: i32) -> (i32, i32) {
    %c0_i32 = arith.constant 0 : i32
    %c0_i32_0 = arith.constant 0 : i32
    return %arg0, %c0_i32 : i32, i32
  }
  func.func @transform_15(%arg0: i32) -> (i32, i32) {
    %c0_i32 = arith.constant 0 : i32
    %c0_i32_0 = arith.constant 0 : i32
    return %arg0, %c0_i32 : i32, i32
  }
  func.func @transform_16(%arg0: i32) -> (i32, i32) {
    %c0_i32 = arith.constant 0 : i32
    %c0_i32_0 = arith.constant 0 : i32
    return %arg0, %c0_i32 : i32, i32
  }
}

</mosaic_0001>

<bundles_post_ra>
// kernel: tpu_custom_call.1
= control target key start
LH: loop header
LB: loop body
LE: loop exit
PB: predicated region body
PF: predicated region fallthrough
CT: control target
= control target key end

     0   :  { %s4892_s21 = smov 0   ;;  %s5577_s0 = inlined_call_operand.vmem [shape: f32[96,32], index: 0, kind: input, shape index: {}]   ;;  %s5578_s1 = inlined_call_operand.vmem [shape: f32[96,32], index: 1, kind: input, shape index: {}]   ;;  %s5579_s2 = inlined_call_operand.vmem [shape: f32[96,32], index: 2, kind: input, shape index: {}]   ;;  %s5580_s3 = inlined_call_operand.vmem [shape: f32[32,32], index: 3, kind: input, shape index: {}]   ;;  %s5581_s4 = inlined_call_operand.vmem [shape: f32[32,32], index: 4, kind: input, shape index: {}]   ;;  %s5582_s5 = inlined_call_operand.vmem [shape: f32[32,32], index: 5, kind: input, shape index: {}]   ;;  %s5583_s6 = inlined_call_operand.vmem [shape: f32[1,32], index: 6, kind: input, shape index: {}]   ;;  %s5584_s7 = inlined_call_operand.vmem [shape: f32[1,32], index: 7, kind: input, shape index: {}]   ;;  %s5585_s8 = inlined_call_operand.vmem [shape: f32[1,32], index: 8, kind: input, shape index: {}]   ;;  %s5586_s9 = inlined_call_operand.vmem [shape: f32[1,32], index: 9, kind: input, shape index: {}]   ;;  %s5587_s10 = inlined_call_operand.vmem [shape: f32[32,128], index: 10, kind: input, shape index: {}]   ;;  %s5588_s11 = inlined_call_operand.vmem [shape: f32[1,128], index: 11, kind: input, shape index: {}]   ;;  %s5589_s12 = inlined_call_operand.vmem [shape: f32[128,32], index: 12, kind: input, shape index: {}]   ;;  %s5590_s13 = inlined_call_operand.vmem [shape: f32[1,32], index: 13, kind: input, shape index: {}]   ;;  %s5591_s14 = inlined_call_operand.vmem [shape: f32[96,32], index: 14, kind: output, shape index: {0}]   ;;  %s5592_s15 = inlined_call_operand.vmem [shape: f32[96,32], index: 15, kind: output, shape index: {1}]   ;;  %s5593_s16 = inlined_call_operand.vmem [shape: f32[96,32], index: 16, kind: output, shape index: {2}]  }
   0x1   :  { %5594 = sst [smem:[#allocation2_spill]] %s5577_s0 }
   0x2 LB: > { %s4232_s22 = sadd.s32 4294967295, %s4797_s21   ;;  %p4236_p0 = scmp.ge.s32.totalorder %s4797_s21, 1  ;;  %s4797_s21 = sphi %s4892_s21, %s27_s21  }
   0x3   : > { %p490_p1 = scmp.lt.s32.totalorder %s4797_s21, 4 }
   0x5   : > { %p491_p2 = pnand %p4236_p0, %p490_p1 }
   0x6   : > { %s4237_s23 = sshll.u32 (!%p491_p2), %s4232_s22, 2  ;;  %s5595_s27 = sld [smem:[#allocation2_spill]] (!%p491_p2) }
   0x7   : > { %494 = sbr.rel (%p491_p2) target bundleno = 3833 (0xef9), region = 76  ;;  %p561_p3 = scmp.lt.s32.totalorder (!%p491_p2), %s4237_s23, 11 }
   0x8   : > { %s4801_s30 = smov (!%p491_p2), 120   ;;  %s4802_s0 = smov (!%p491_p2), 112  }
   0x9   : > { %s4803_s17 = smov (!%p491_p2), 104   ;;  %s4804_s18 = smov (!%p491_p2), 8  }
   0xa   : > { %s4805_s19 = smov (!%p491_p2), 16  }
   0xc   : > { %s5597_s23 = smov (!%p561_p3, %s4237_s23), 11  ;;  %vm602_vm0 = vcmask 261120   ;;  %v679_v28 = vld [vmem:[%s5580_s3 + $0x18] sm:$0xff]  ;;  %v678_v29 = vld [vmem:[%s5580_s3 + $0x10] sm:$0xff]  ;;  %v677_v30 = vld [vmem:[%s5580_s3 + $0x8] sm:$0xff]  ;;  %vm4800_vm1 = vmmov 0  }
   0xd   : > { %s4900_s24 = sshll.u32 %s5597_s23, 3  ;;  %4437 = vmatprep.subr.mxu0 %v679_v28  ;;  %v676_v31 = vld [vmem:[%s5580_s3] sm:$0xff]  ;;  %v784_v32 = vld [vmem:[%s5581_s4 + $0x18] sm:$0xff]  ;;  %v783_v61 = vld [vmem:[%s5581_s4 + $0x10] sm:$0xff]  ;;  %vm991_vm2 = vcmask 64512   ;;  %vm3704_vm3 = vcmask 130048  }
   0xe   : > { %s4906_s28 = scalar_lea.vmem %s5595_s27, %s4900_s24  ;;  %4438 = vmatpush3.msra.mxu0 %v679_v28  ;;  %v4249_v46 = vld [vmem:[%s5583_s6] ss:$0 sm:$0xff]  ;;  %s570_s20 = scalar_lea.vmem %s5578_s1, %s4900_s24  ;;  %v782_v63 = vld [vmem:[%s5581_s4 + $0x8] sm:$0xff]  ;;  %vm3709_vm4 = vcmask 195584  }
   0xf   : > { %v596_v0 = vld [vmem:[%s4906_s28] sm:$0xff]  ;;  %v598_v1 = vld [vmem:[%s4906_s28 + $0x10] sm:$0xff]  ;;  %v597_v2 = vld [vmem:[%s4906_s28 + $0x8] sm:$0xff]  ;;  %4439 = vmatprep.subr.mxu0 %v678_v29  ;;  %s576_s25 = scalar_lea.vmem %s5579_s2, %s4900_s24  ;;  %s594_s29 = scalar_lea.vmem %s5593_s16, %s4900_s24 }
  0x10   : > { %v603_v3 = vsel %vm602_vm0, %v596_v0, 0.0  ;;  %v609_v4 = vsel %vm602_vm0, %v598_v1, 0.0  ;;  %v599_v5 = vld [vmem:[%s4906_s28 + $0x18] sm:$0xff]  ;;  %v606_v6 = vsel %vm602_vm0, %v597_v2, 0.0  ;;  %4440 = vmatpush3.msra.mxu0 %v678_v29  ;;  %v4250_v48 = vld [vmem:[%s5584_s7] ss:$0 sm:$0xff]  ;;  %s5508_s23 = scalar_lea.vmem %s5592_s15, %s4900_s24  ;;  %s582_s26 = scalar_lea.vmem %s5591_s14, %s4900_s24 }
  0x11   : > { %604 = vadd.xlane.f32.xlu0 %v603_v3  ;;  %610 = vadd.xlane.f32.xlu1 %v609_v4  ;;  %v612_v7 = vsel %vm602_vm0, %v599_v5, 0.0  ;;  %v778_v3 = vld [vmem:[%s570_s20 + $0x8] sm:$0xff]  ;;  %v779_v4 = vld [vmem:[%s570_s20 + $0x10] sm:$0xff] }
  0x12   : > { %4441 = vmatprep.subr.mxu0 %v677_v30 }
  0x13   : > { %4442 = vmatpush3.msra.mxu0 %v677_v30 }
  0x14   : > { %4443 = vmatprep.subr.mxu0 %v676_v31 }
  0x15   : > { %607 = vadd.xlane.f32.xlu0 %v606_v6  ;;  %613 = vadd.xlane.f32.xlu1 %v612_v7  ;;  %v889_v6 = vld [vmem:[%s5582_s5 + $0x18] sm:$0xff]  ;;  %v888_v7 = vld [vmem:[%s5582_s5 + $0x10] sm:$0xff] }
  0x16   : > { %4444 = vmatpush3.msra.mxu0 %v676_v31 }
  0x17   : > { %4451 = vmatprep.subr.mxu0 %v784_v32 }
  0x9a   : > { %v605_v8 = vpop.xlane.xlu0 %604  ;;  %v611_v9 = vpop.xlane.xlu1 %610 }
  0x9b   : > { %v616_v10 = vmul.f32 0.03125, %v605_v8  ;;  %v618_v11 = vmul.f32 0.03125, %v611_v9  ;;  %v887_v8 = vld [vmem:[%s5582_s5 + $0x8] sm:$0xff]  ;;  %v886_v9 = vld [vmem:[%s5582_s5] sm:$0xff] }
  0x9d   : > { %v620_v12 = vsub.f32 %v596_v0, %v616_v10  ;;  %v622_v13 = vsub.f32 %v598_v1, %v618_v11  ;;  %v777_v1 = vld [vmem:[%s570_s20] sm:$0xff]  ;;  %v883_v11 = vld [vmem:[%s576_s25 + $0x8] sm:$0xff] }
  0x9e   : > { %v608_v14 = vpop.xlane.xlu0 %607  ;;  %v614_v15 = vpop.xlane.xlu1 %613  ;;  %v882_v10 = vld [vmem:[%s576_s25] sm:$0xff] }
  0x9f   : > { %v617_v16 = vmul.f32 0.03125, %v608_v14  ;;  %v619_v17 = vmul.f32 0.03125, %v614_v15  ;;  %v624_v18 = vmul.f32 %v620_v12, %v620_v12  ;;  %v626_v19 = vmul.f32 %v622_v13, %v622_v13  ;;  %v885_v14 = vld [vmem:[%s576_s25 + $0x18] sm:$0xff] }
  0xa1   : > { %v621_v20 = vsub.f32 %v597_v2, %v617_v16  ;;  %v623_v21 = vsub.f32 %v599_v5, %v619_v17  ;;  %v628_v22 = vsel %vm602_vm0, %v624_v18, 0.0  ;;  %v634_v23 = vsel %vm602_vm0, %v626_v19, 0.0  ;;  %v781_v2 = vld [vmem:[%s5581_s4] sm:$0xff]  ;;  %v780_v5 = vld [vmem:[%s570_s20 + $0x18] sm:$0xff]  ;;  %s4806_s20 = smov 24  }
  0xa2   : > { %629 = vadd.xlane.f32.xlu0 %v628_v22 }
  0xa3   : > { %v625_v24 = vmul.f32 %v621_v20, %v621_v20  ;;  %v627_v25 = vmul.f32 %v623_v21, %v623_v21 }
  0xa5   : > { %v631_v26 = vsel %vm602_vm0, %v625_v24, 0.0  ;;  %v637_v27 = vsel %vm602_vm0, %v627_v25, 0.0 }
  0xa6   : > { %635 = vadd.xlane.f32.xlu0 %v634_v23  ;;  %632 = vadd.xlane.f32.xlu1 %v631_v26 }
  0xaa   : > { %638 = vadd.xlane.f32.xlu1 %v637_v27 }
 0x12b   : > { %v630_v33 = vpop.xlane.xlu0 %629 }
 0x12c   : > { %v640_v34 = vmul.f32 0.03125, %v630_v33 }
 0x12e   : > { %v644_v35 = vadd.f32 1e-06, %v640_v34 }
 0x12f   : > { %v633_v36 = vpop.xlane.xlu1 %632  ;;  %v636_v37 = vpop.xlane.xlu0 %635 }
 0x130   : > { %4707 = vrsqrt.f32 %v644_v35  ;;  %v641_v38 = vmul.f32 0.03125, %v633_v36  ;;  %v642_v39 = vmul.f32 0.03125, %v636_v37 }
 0x132   : > { %v645_v40 = vadd.f32 1e-06, %v641_v38  ;;  %v646_v41 = vadd.f32 1e-06, %v642_v39 }
 0x133   : > { %v639_v42 = vpop.xlane.xlu1 %638 }
 0x134   : > { %4709 = vrsqrt.f32 %v645_v40  ;;  %v643_v43 = vmul.f32 0.03125, %v639_v42 }
 0x135   : > { %4711 = vrsqrt.f32 %v646_v41 }
 0x136   : > { %v647_v44 = vadd.f32 1e-06, %v643_v43 }
 0x138   : > { %4713 = vrsqrt.f32 %v647_v44 }
 0x13d   : > { %v4708_v45 = vpop.eup %4707 }
 0x13e   : > { %v652_v47 = vmul.f32 %v4708_v45, %v620_v12  ;;  %v4799_v12 = vmov 0.0  }
 0x13f   : > { %4479 = vmatprep.subr.mxu1 %v4799_v12  ;;  %4481 = vmatprep.mubr.msk.f32.mxu1 %vm4800_vm1, %v4799_v12 }
 0x140   : > { %v662_v49 = vmul.f32 %v4249_v46, %v652_v47 }
 0x141   : > { %v4710_v50 = vpop.eup %4709 }
 0x142   : > { %v4712_v51 = vpop.eup %4711  ;;  %v672_v52 = vadd.f32 %v4250_v48, %v662_v49  ;;  %v653_v53 = vmul.f32 %v4710_v50, %v621_v20 }
 0x143   : > { %v654_v54 = vmul.f32 %v4712_v51, %v622_v13  ;;  %v884_v13 = vld [vmem:[%s576_s25 + $0x10] sm:$0xff] }
 0x144   : > { %4445 = vmatprep.mubr.msk.f32.mxu0 %vm602_vm0, %v672_v52  ;;  %v663_v55 = vmul.f32 %v4249_v46, %v653_v53 }
 0x145   : > { %v4714_v56 = vpop.eup %4713  ;;  %v664_v57 = vmul.f32 %v4249_v46, %v654_v54 }
 0x146   : > { %v673_v58 = vadd.f32 %v4250_v48, %v663_v55  ;;  %v655_v59 = vmul.f32 %v4714_v56, %v623_v21 }
 0x147   : > { %v674_v60 = vadd.f32 %v4250_v48, %v664_v57 }
 0x148   : > { %4446 = vmatmul.mubr.msk.f32.vlgmr.msra.gmra.mxu0 %vm602_vm0, %v673_v58  ;;  %v665_v62 = vmul.f32 %v4249_v46, %v655_v59 }
 0x149   : > { %4448 = vmatprep.mubr.msk.f32.mxu0 %vm602_vm0, %v674_v60  ;;  %4452 = vmatpush3.msra.mxu0 %v784_v32 }
 0x14a   : > { %4453 = vmatprep.subr.mxu0 %v783_v61  ;;  %v675_v0 = vadd.f32 %v4250_v48, %v665_v62 }
 0x14b   : > { %4454 = vmatpush3.msra.mxu0 %v783_v61 }
 0x14c   : > { %4449 = vmatmul.mubr.msk.f32.gmra.mxu0 %vm602_vm0, %v675_v0  ;;  %4455 = vmatprep.subr.mxu0 %v782_v63 }
 0x14d   : > { %4456 = vmatpush3.msra.mxu0 %v782_v63  ;;  %4459 = vmatprep.mubr.msk.f32.mxu0 %vm602_vm0, %v777_v1 }
 0x14e   : > { %4457 = vmatprep.subr.mxu0 %v781_v2 }
 0x14f   : > { %4458 = vmatpush3.msra.mxu0 %v781_v2 }
 0x150   : > { %4460 = vmatmul.mubr.msk.f32.vlgmr.msra.gmra.mxu0 %vm602_vm0, %v778_v3  ;;  %4465 = vmatprep.subr.mxu0 %v889_v6 }
 0x151   : > { %4462 = vmatprep.mubr.msk.f32.mxu0 %vm602_vm0, %v779_v4  ;;  %4466 = vmatpush3.msra.mxu0 %v889_v6 }
 0x152   : > { %4467 = vmatprep.subr.mxu0 %v888_v7 }
 0x153   : > { %4468 = vmatpush3.msra.mxu0 %v888_v7 }
 0x154   : > { %4463 = vmatmul.mubr.msk.f32.gmra.mxu0 %vm602_vm0, %v780_v5  ;;  %4469 = vmatprep.subr.mxu0 %v887_v8 }
 0x155   : > { %4470 = vmatpush3.msra.mxu0 %v887_v8  ;;  %4473 = vmatprep.mubr.msk.f32.mxu0 %vm602_vm0, %v882_v10 }
 0x156   : > { %4471 = vmatprep.subr.mxu0 %v886_v9 }
 0x157   : > { %4472 = vmatpush3.msra.mxu0 %v886_v9 }
 0x158   : > { %4474 = vmatmul.mubr.msk.f32.vlgmr.msra.gmra.mxu0 %vm602_vm0, %v883_v11  ;;  %4489 = vmatprep.subr.mxu0 %v4799_v12 }
 0x159   : > { %4476 = vmatprep.mubr.msk.f32.mxu0 %vm602_vm0, %v884_v13 }
 0x15c   : > { %4477 = vmatmul.mubr.msk.f32.gmra.mxu0 %vm602_vm0, %v885_v14 }
 0x15d   : > { %4491 = vmatprep.mubr.msk.f32.mxu0 %vm4800_vm1, %v4799_v12 }
 0x208   : > { %v4988_v15 = vpop.f32.mrf.mxu0 }
 0x20a   : > { %v4990_v16 = vpop.f32.mrf.mxu0 }
 0x20c   : > { %v4992_v17 = vpop.f32.mrf.mxu0 }
 0x20e   : > { %v4994_v18 = vpop.f32.mrf.mxu0 }
 0x210   : > { %v4996_v19 = vpop.f32.mrf.mxu0 }
 0x212   : > { %v4998_v20 = vpop.f32.mrf.mxu0 }
 0x213   : > { %4480 = vmatpush3.xpose.msk.msra.mxu1 %vm991_vm2, %v4998_v20 }
 0x214   : > { %v5002_v21 = vpop.f32.mrf.mxu0  ;;  %4484 = vmatprep.subr.mxu1 %v4799_v12 }
 0x216   : > { %v5005_v22 = vpop.f32.mrf.mxu0  ;;  %4482 = vmatmul.mubr.msk.f32.vlgmr.msra.gmra.mxu1 %vm991_vm2, %v4990_v16 }
 0x217   : > { %4485 = vmatpush3.xpose.msk.msra.mxu1 %vm991_vm2, %v4996_v19  ;;  %4490 = vmatpush3.xpose.msk.msra.mxu0 %vm991_vm2, %v5005_v22 }
 0x218   : > { %4486 = vmatprep.mubr.msk.f32.mxu1 %vm4800_vm1, %v4799_v12  ;;  %4494 = vmatprep.subr.mxu1 %v4799_v12  ;;  %v5036_v23 = vpop.f32.mrf.mxu0 }
 0x219   : > { %4499 = vmatprep.subr.mxu0 %v4799_v12  ;;  %988 = vst.msk [vmem:[%s594_s29 + $0x8] sm:$0xff] %vm602_vm0, %v5036_v23 }
 0x21a   : > { %4487 = vmatmul.mubr.msk.f32.vlgmr.msra.gmra.mxu1 %vm991_vm2, %v4988_v15  ;;  %4492 = vmatmul.mubr.msk.f32.vlgmr.msra.gmra.mxu0 %vm991_vm2, %v4994_v18  ;;  %v5041_v24 = vpop.f32.mrf.mxu0 }
 0x21b   : > { %4495 = vmatpush3.xpose.msk.msra.mxu1 %vm991_vm2, %v5002_v21  ;;  %4496 = vmatprep.mubr.msk.f32.mxu1 %vm4800_vm1, %v4799_v12  ;;  %987 = vst.msk [vmem:[%s594_s29] sm:$0xff] %vm602_vm0, %v5041_v24 }
 0x21c   : > { %4504 = vmatprep.subr.mxu1 %v4799_v12  ;;  %4501 = vmatprep.mubr.msk.f32.mxu0 %vm4800_vm1, %v4799_v12  ;;  %v5047_v25 = vpop.f32.mrf.mxu0 }
 0x21d   : > { %4500 = vmatpush3.msra.mxu0 %v5041_v24  ;;  %990 = vst.msk [vmem:[%s594_s29 + $0x18] sm:$0xff] %vm602_vm0, %v5047_v25 }
 0x21e   : > { %4497 = vmatmul.mubr.msk.f32.vlgmr.msra.gmra.mxu1 %vm991_vm2, %v4992_v17  ;;  %4509 = vmatprep.subr.mxu0 %v4799_v12  ;;  %v5052_v26 = vpop.f32.mrf.mxu0 }
 0x21f   : > { %4506 = vmatprep.mubr.msk.f32.mxu1 %vm4800_vm1, %v4799_v12  ;;  %4505 = vmatpush3.msra.mxu1 %v5036_v23  ;;  %989 = vst.msk [vmem:[%s594_s29 + $0x10] sm:$0xff] %vm602_vm0, %v5052_v26 }
 0x220   : > { %4514 = vmatprep.subr.mxu1 %v4799_v12 }
 0x2d6   : > { %v1064_v27 = vpop.f32.mrf.mxu1 }
 0x2d7   : > { %v1296_v28 = vsel %vm991_vm2, %v1064_v27, -inf }
 0x2d8   : > { %1297 = vmax.xlane.f32.xlu0 %v1296_v28  ;;  %v4483_v29 = vpop.f32.mrf.mxu1 }
 0x2da   : > { %v1140_v30 = vpop.f32.mrf.mxu1  ;;  %v1216_v31 = vpop.f32.mrf.mxu0 }
 0x2db   : > { %v1299_v32 = vsel %vm991_vm2, %v1140_v30, -inf  ;;  %v1302_v33 = vsel %vm991_vm2, %v1216_v31, -inf }
 0x2dc   : > { %1300 = vmax.xlane.f32.xlu1 %v1299_v32  ;;  %v4488_v34 = vpop.f32.mrf.mxu1  ;;  %1303 = vmax.xlane.f32.xlu0 %v1302_v33  ;;  %v4493_v35 = vpop.f32.mrf.mxu0 }
 0x2de   : > { %v1292_v36 = vpop.f32.mrf.mxu1 }
 0x2df   : > { %v1305_v37 = vsel %vm991_vm2, %v1292_v36, -inf }
 0x2e0   : > { %1306 = vmax.xlane.f32.xlu1 %v1305_v37  ;;  %v4498_v38 = vpop.f32.mrf.mxu1 }
 0x361   : > { %v1298_v39 = vpop.xlane.xlu0 %1297 }
 0x362   : > { %v1308_v40 = vsub.f32 %v1064_v27, %v1298_v39 }
 0x364   : > { %v1312_v41 = vmul.f32 1.442695, %v1308_v40 }
 0x365   : > { %v1301_v42 = vpop.xlane.xlu1 %1300  ;;  %v1304_v43 = vpop.xlane.xlu0 %1303 }
 0x366   : > { %4715 = vpow2.f32 %v1312_v41  ;;  %v1309_v44 = vsub.f32 %v1140_v30, %v1301_v42  ;;  %v1310_v45 = vsub.f32 %v1216_v31, %v1304_v43 }
 0x368   : > { %v1314_v46 = vmul.f32 1.442695, %v1309_v44  ;;  %v1316_v47 = vmul.f32 1.442695, %v1310_v45 }
 0x369   : > { %v1307_v54 = vpop.xlane.xlu1 %1306 }
 0x36a   : > { %4717 = vpow2.f32 %v1314_v46  ;;  %v1311_v55 = vsub.f32 %v1292_v36, %v1307_v54 }
 0x36b   : > { %4719 = vpow2.f32 %v1316_v47 }
 0x36c   : > { %v1318_v56 = vmul.f32 1.442695, %v1311_v55 }
 0x36e   : > { %4721 = vpow2.f32 %v1318_v56 }
 0x373   : > { %v4716_v48 = vpop.eup %4715 }
 0x374   : > { %v1320_v49 = vsel %vm991_vm2, %v4716_v48, 0.0 }
 0x375   : > { %1321 = vadd.xlane.f32.xlu0 %v1320_v49 }
 0x377   : > { %v4718_v50 = vpop.eup %4717 }
 0x378   : > { %v4720_v51 = vpop.eup %4719  ;;  %v1323_v52 = vsel %vm991_vm2, %v4718_v50, 0.0 }
 0x379   : > { %1324 = vadd.xlane.f32.xlu1 %v1323_v52  ;;  %v1326_v53 = vsel %vm991_vm2, %v4720_v51, 0.0 }
 0x37a   : > { %1327 = vadd.xlane.f32.xlu0 %v1326_v53 }
 0x37b   : > { %v4722_v57 = vpop.eup %4721 }
 0x37c   : > { %v1329_v58 = vsel %vm991_vm2, %v4722_v57, 0.0 }
 0x38a   : > { %1724 = vrot.lane.b32.xlu1 %v4996_v19, %s4801_s30 }
 0x38e   : > { %1644 = vrot.lane.b32.xlu1 %v4990_v16, %s4801_s30 }
 0x390   : > { %1646 = vrot.lane.b32.xlu0 %v4998_v20, %s4801_s30 }
 0x394   : > { %1802 = vrot.lane.b32.xlu0 %v5005_v22, %s4801_s30 }
 0x398   : > { %1800 = vrot.lane.b32.xlu0 %v4994_v18, %s4801_s30 }
 0x3b2   : > { %1330 = vadd.xlane.f32.xlu1 %v1329_v58 }
 0x3c3   : > { %1722 = vrot.lane.b32.xlu1 %v4988_v15, %s4801_s30 }
 0x3c7   : > { %1880 = vrot.lane.b32.xlu1 %v5002_v21, %s4801_s30 }
 0x3cb   : > { %1878 = vrot.lane.b32.xlu1 %v4992_v17, %s4801_s30 }
 0x3fe   : > { %v1322_v59 = vpop.xlane.xlu0 %1321 }
 0x3ff   : > { %4723 = vrcp.f32 %v1322_v59 }
 0x402   : > { %v1325_v60 = vpop.xlane.xlu1 %1324 }
 0x403   : > { %4725 = vrcp.f32 %v1325_v60  ;;  %v1328_v61 = vpop.xlane.xlu0 %1327 }
 0x404   : > { %4727 = vrcp.f32 %v1328_v61 }
 0x406   : > { %v1725_v14 = vpop.permute.xlu1 %1724 }
 0x407   : > { %v1647_v10 = vpop.permute.xlu0 %1646 }
 0x40a   : > { %v1645_v29 = vpop.permute.xlu1 %1644 }
 0x40b   : > { %v1803_v28 = vpop.permute.xlu0 %1802 }
 0x40c   : > { %v4724_v62 = vpop.eup %4723 }
 0x40d   : > { %v1336_v63 = vmul.f32 %v4724_v62, %v1322_v59 }
 0x40f   : > { %v1340_v0 = vsub.f32 2.0, %v1336_v63  ;;  %v1801_v30 = vpop.permute.xlu0 %1800 }
 0x410   : > { %v4726_v1 = vpop.eup %4725 }
 0x411   : > { %v4728_v2 = vpop.eup %4727  ;;  %v1344_v3 = vmul.f32 %v4724_v62, %v1340_v0  ;;  %v1337_v4 = vmul.f32 %v4726_v1, %v1325_v60 }
 0x412   : > { %v1338_v5 = vmul.f32 %v4728_v2, %v1328_v61 }
 0x413   : > { %v5080_v6 = vmul.f32 %v4716_v48, %v1344_v3  ;;  %v1341_v7 = vsub.f32 2.0, %v1337_v4 }
 0x414   : > { %v1342_v8 = vsub.f32 2.0, %v1338_v5 }
 0x415   : > { %v1345_v9 = vmul.f32 %v4726_v1, %v1341_v7  ;;  %4502 = vmatmul.mubr.msk.f32.vlgmr.msra.gmra.mxu0 %vm991_vm2, %v5080_v6 }
 0x416   : > { %v1346_v11 = vmul.f32 %v4728_v2, %v1342_v8  ;;  %4510 = vmatpush3.msra.mxu0 %v5052_v26  ;;  %4511 = vmatprep.mubr.msk.f32.mxu0 %vm4800_vm1, %v4799_v12 }
 0x417   : > { %v5087_v13 = vmul.f32 %v4718_v50, %v1345_v9  ;;  %4519 = vmatprep.subr.mxu0 %v4799_v12 }
 0x418   : > { %v5090_v27 = vmul.f32 %v4720_v51, %v1346_v11 }
 0x419   : > { %4507 = vmatmul.mubr.msk.f32.vlgmr.msra.gmra.mxu1 %vm991_vm2, %v5087_v13 }
 0x41a   : > { %4512 = vmatmul.mubr.msk.f32.vlgmr.msra.gmra.mxu0 %vm991_vm2, %v5090_v27  ;;  %4515 = vmatpush3.msra.mxu1 %v5047_v25 }
 0x41b   : > { %4520 = vmatpush3.xpose.msk.msra.mxu0 %vm991_vm2, %v1647_v10  ;;  %4521 = vmatprep.mubr.msk.f32.mxu0 %vm4800_vm1, %v4799_v12 }
 0x41c   : > { %4529 = vmatprep.subr.mxu0 %v4799_v12  ;;  %4516 = vmatprep.mubr.msk.f32.mxu1 %vm4800_vm1, %v4799_v12 }
 0x41d   : > { %4524 = vmatprep.subr.mxu1 %v4799_v12 }
 0x41e   : > { %4522 = vmatmul.mubr.msk.f32.vlgmr.msra.gmra.mxu0 %vm991_vm2, %v1645_v29 }
 0x41f   : > { %4530 = vmatpush3.xpose.msk.msra.mxu0 %vm991_vm2, %v1803_v28  ;;  %4531 = vmatprep.mubr.msk.f32.mxu0 %vm4800_vm1, %v4799_v12 }
 0x420   : > { %4539 = vmatprep.subr.mxu0 %v4799_v12 }
 0x422   : > { %4532 = vmatmul.mubr.msk.f32.vlgmr.msra.gmra.mxu0 %vm991_vm2, %v1801_v30 }
 0x423   : > { %4541 = vmatprep.mubr.msk.f32.mxu0 %vm4800_vm1, %v4799_v12 }
 0x43b   : > { %v1331_v31 = vpop.xlane.xlu1 %1330 }
 0x43c   : > { %4729 = vrcp.f32 %v1331_v31 }
 0x43f   : > { %v1723_v35 = vpop.permute.xlu1 %1722 }
 0x443   : > { %v1881_v38 = vpop.permute.xlu1 %1880 }
 0x447   : > { %v1879_v39 = vpop.permute.xlu1 %1878 }
 0x449   : > { %v4730_v32 = vpop.eup %4729 }
 0x44a   : > { %v1339_v33 = vmul.f32 %v4730_v32, %v1331_v31 }
 0x44c   : > { %v1343_v34 = vsub.f32 2.0, %v1339_v33 }
 0x44e   : > { %v1347_v36 = vmul.f32 %v4730_v32, %v1343_v34 }
 0x450   : > { %v5112_v37 = vmul.f32 %v4722_v57, %v1347_v36 }
 0x452   : > { %4517 = vmatmul.mubr.msk.f32.vlgmr.msra.gmra.mxu1 %vm991_vm2, %v5112_v37 }
 0x453   : > { %4525 = vmatpush3.xpose.msk.msra.mxu1 %vm991_vm2, %v1725_v14  ;;  %4526 = vmatprep.mubr.msk.f32.mxu1 %vm4800_vm1, %v4799_v12 }
 0x454   : > { %4534 = vmatprep.subr.mxu1 %v4799_v12 }
 0x456   : > { %4527 = vmatmul.mubr.msk.f32.vlgmr.msra.gmra.mxu1 %vm991_vm2, %v1723_v35 }
 0x457   : > { %4535 = vmatpush3.xpose.msk.msra.mxu1 %vm991_vm2, %v1881_v38  ;;  %4536 = vmatprep.mubr.msk.f32.mxu1 %vm4800_vm1, %v4799_v12 }
 0x458   : > { %4544 = vmatprep.subr.mxu1 %v4799_v12 }
 0x45a   : > { %4537 = vmatmul.mubr.msk.f32.vlgmr.msra.gmra.mxu1 %vm991_vm2, %v1879_v39 }
 0x45b   : > { %4546 = vmatprep.mubr.msk.f32.mxu1 %vm4800_vm1, %v4799_v12 }
 0x4d5   : > { %v5128_v40 = vpop.f32.mrf.mxu0 }
 0x4d7   : > { %v4503_v41 = vpop.f32.mrf.mxu0 }
 0x4d9   : > { %v5130_v42 = vpop.f32.mrf.mxu1 }
 0x4da   : > { %v5132_v43 = vpop.f32.mrf.mxu0 }
 0x4db   : > { %v4508_v44 = vpop.f32.mrf.mxu1 }
 0x4dc   : > { %v4513_v45 = vpop.f32.mrf.mxu0 }
 0x4de   : > { %v1718_v46 = vpop.f32.mrf.mxu0 }
 0x4df   : > { %v1956_v47 = vsel %vm991_vm2, %v1718_v46, -inf }
 0x4e0   : > { %1957 = vmax.xlane.f32.xlu0 %v1956_v47  ;;  %v4523_v48 = vpop.f32.mrf.mxu0 }
 0x4e2   : > { %v1874_v49 = vpop.f32.mrf.mxu0 }
 0x4e3   : > { %v1962_v50 = vsel %vm991_vm2, %v1874_v49, -inf }
 0x4e4   : > { %1963 = vmax.xlane.f32.xlu0 %v1962_v50  ;;  %v4533_v51 = vpop.f32.mrf.mxu0 }
 0x512   : > { %v5136_v52 = vpop.f32.mrf.mxu1 }
 0x514   : > { %v4518_v53 = vpop.f32.mrf.mxu1 }
 0x516   : > { %v1796_v54 = vpop.f32.mrf.mxu1 }
 0x517   : > { %v1959_v55 = vsel %vm991_vm2, %v1796_v54, -inf }
 0x518   : > { %1960 = vmax.xlane.f32.xlu1 %v1959_v55  ;;  %v4528_v56 = vpop.f32.mrf.mxu1 }
 0x51a   : > { %v1952_v57 = vpop.f32.mrf.mxu1 }
 0x51b   : > { %v1965_v58 = vsel %vm991_vm2, %v1952_v57, -inf }
 0x51c   : > { %v4538_v59 = vpop.f32.mrf.mxu1  ;;  %1966 = vmax.xlane.f32.xlu0 %v1965_v58 }
 0x529   : > { %2090 = vrot.lane.b32.xlu1 %v5036_v23, %s4801_s30 }
 0x52d   : > { %2167 = vrot.lane.b32.xlu1 %v5052_v26, %s4801_s30 }
 0x531   : > { %2244 = vrot.lane.b32.xlu1 %v5047_v25, %s4801_s30 }
 0x532   : > { %2013 = vrot.lane.b32.xlu0 %v5041_v24, %s4801_s30 }
 0x569   : > { %v1958_v60 = vpop.xlane.xlu0 %1957 }
 0x56a   : > { %v1968_v61 = vsub.f32 %v1718_v46, %v1958_v60 }
 0x56c   : > { %v1972_v62 = vmul.f32 1.442695, %v1968_v61 }
 0x56d   : > { %v1964_v63 = vpop.xlane.xlu0 %1963 }
 0x56e   : > { %4731 = vpow2.f32 %v1972_v62  ;;  %v1970_v0 = vsub.f32 %v1874_v49, %v1964_v63 }
 0x570   : > { %v1976_v1 = vmul.f32 1.442695, %v1970_v0 }
 0x572   : > { %4733 = vpow2.f32 %v1976_v1 }
 0x57b   : > { %v4732_v2 = vpop.eup %4731 }
 0x57c   : > { %v1980_v3 = vsel %vm991_vm2, %v4732_v2, 0.0 }
 0x57d   : > { %1981 = vadd.xlane.f32.xlu0 %v1980_v3 }
 0x57f   : > { %v4734_v4 = vpop.eup %4733 }
 0x580   : > { %v1986_v5 = vsel %vm991_vm2, %v4734_v4, 0.0 }
 0x581   : > { %1987 = vadd.xlane.f32.xlu0 %v1986_v5 }
 0x597   : > { %2322 = vrot.lane.b32.xlu0 %v4998_v20, %s4802_s0 }
 0x59b   : > { %2320 = vrot.lane.b32.xlu0 %v4990_v16, %s4802_s0 }
 0x59f   : > { %2478 = vrot.lane.b32.xlu0 %v5005_v22, %s4802_s0 }
 0x5a1   : > { %v1961_v7 = vpop.xlane.xlu1 %1960 }
 0x5a2   : > { %v1969_v8 = vsub.f32 %v1796_v54, %v1961_v7 }
 0x5a3   : > { %2476 = vrot.lane.b32.xlu0 %v4994_v18, %s4802_s0 }
 0x5a4   : > { %v1974_v9 = vmul.f32 1.442695, %v1969_v8 }
 0x5a5   : > { %v2091_v10 = vpop.permute.xlu1 %2090  ;;  %v1967_v11 = vpop.xlane.xlu0 %1966 }
 0x5a6   : > { %4735 = vpow2.f32 %v1974_v9  ;;  %4545 = vmatpush3.msra.mxu1 %v2091_v10  ;;  %v1971_v30 = vsub.f32 %v1952_v57, %v1967_v11 }
 0x5a7   : > { %4554 = vmatprep.subr.mxu1 %v4799_v12 }
 0x5a8   : > { %v1978_v31 = vmul.f32 1.442695, %v1971_v30 }
 0x5a9   : > { %v2014_v14 = vpop.permute.xlu0 %2013  ;;  %v2168_v50 = vpop.permute.xlu1 %2167 }
 0x5aa   : > { %4540 = vmatpush3.msra.mxu0 %v2014_v14  ;;  %4737 = vpow2.f32 %v1978_v31 }
 0x5ab   : > { %4549 = vmatprep.subr.mxu0 %v4799_v12 }
 0x5ad   : > { %v2245_v56 = vpop.permute.xlu1 %2244 }
 0x5b3   : > { %v4736_v28 = vpop.eup %4735 }
 0x5b4   : > { %v1983_v29 = vsel %vm991_vm2, %v4736_v28, 0.0 }
 0x5b5   : > { %1984 = vadd.xlane.f32.xlu1 %v1983_v29 }
 0x5b7   : > { %v4738_v32 = vpop.eup %4737 }
 0x5b8   : > { %v1989_v33 = vsel %vm991_vm2, %v4738_v32, 0.0 }
 0x5c6   : > { %2400 = vrot.lane.b32.xlu1 %v4996_v19, %s4802_s0 }
 0x5ea   : > { %1990 = vadd.xlane.f32.xlu1 %v1989_v33 }
 0x5fb   : > { %2398 = vrot.lane.b32.xlu1 %v4988_v15, %s4802_s0 }
 0x5ff   : > { %2556 = vrot.lane.b32.xlu1 %v5002_v21, %s4802_s0 }
 0x603   : > { %2554 = vrot.lane.b32.xlu1 %v4992_v17, %s4802_s0 }
 0x606   : > { %v1982_v34 = vpop.xlane.xlu0 %1981 }
 0x607   : > { %4739 = vrcp.f32 %v1982_v34 }
 0x60a   : > { %v1988_v35 = vpop.xlane.xlu0 %1987 }
 0x60b   : > { %4741 = vrcp.f32 %v1988_v35 }
 0x60e   : > { %v2323_v39 = vpop.permute.xlu0 %2322 }
 0x612   : > { %v2321_v49 = vpop.permute.xlu0 %2320 }
 0x614   : > { %v4740_v36 = vpop.eup %4739 }
 0x615   : > { %v1996_v38 = vmul.f32 %v4740_v36, %v1982_v34 }
 0x616   : > { %v2479_v54 = vpop.permute.xlu0 %2478 }
 0x617   : > { %v2000_v41 = vsub.f32 2.0, %v1996_v38 }
 0x618   : > { %v4742_v44 = vpop.eup %4741 }
 0x619   : > { %v2004_v45 = vmul.f32 %v4740_v36, %v2000_v41  ;;  %v1998_v46 = vmul.f32 %v4742_v44, %v1988_v35 }
 0x61a   : > { %v2477_v55 = vpop.permute.xlu0 %2476 }
 0x61b   : > { %v5170_v47 = vmul.f32 %v4732_v2, %v2004_v45  ;;  %v2002_v48 = vsub.f32 2.0, %v1998_v46 }
 0x61d   : > { %v2006_v51 = vmul.f32 %v4742_v44, %v2002_v48  ;;  %4542 = vmatmul.mubr.msk.f32.vlgmr.msra.gmra.mxu0 %vm991_vm2, %v5170_v47 }
 0x61e   : > { %4550 = vmatpush3.msra.mxu0 %v2168_v50  ;;  %4551 = vmatprep.mubr.msk.f32.mxu0 %vm4800_vm1, %v4799_v12 }
 0x61f   : > { %v5176_v53 = vmul.f32 %v4734_v4, %v2006_v51  ;;  %4559 = vmatprep.subr.mxu0 %v4799_v12 }
 0x621   : > { %4552 = vmatmul.mubr.msk.f32.vlgmr.msra.gmra.mxu0 %vm991_vm2, %v5176_v53 }
 0x622   : > { %4560 = vmatpush3.xpose.msk.msra.mxu0 %vm991_vm2, %v2323_v39  ;;  %4561 = vmatprep.mubr.msk.f32.mxu0 %vm4800_vm1, %v4799_v12 }
 0x623   : > { %4569 = vmatprep.subr.mxu0 %v4799_v12 }
 0x625   : > { %4562 = vmatmul.mubr.msk.f32.vlgmr.msra.gmra.mxu0 %vm991_vm2, %v2321_v49 }
 0x626   : > { %4570 = vmatpush3.xpose.msk.msra.mxu0 %vm991_vm2, %v2479_v54  ;;  %4571 = vmatprep.mubr.msk.f32.mxu0 %vm4800_vm1, %v4799_v12 }
 0x627   : > { %4579 = vmatprep.subr.mxu0 %v4799_v12 }
 0x629   : > { %4572 = vmatmul.mubr.msk.f32.vlgmr.msra.gmra.mxu0 %vm991_vm2, %v2477_v55 }
 0x62a   : > { %4581 = vmatprep.mubr.msk.f32.mxu0 %vm4800_vm1, %v4799_v12 }
 0x63e   : > { %v1985_v57 = vpop.xlane.xlu1 %1984 }
 0x63f   : > { %4743 = vrcp.f32 %v1985_v57 }
 0x642   : > { %v2401_v63 = vpop.permute.xlu1 %2400 }
 0x64c   : > { %v4744_v58 = vpop.eup %4743 }
 0x64d   : > { %v1997_v59 = vmul.f32 %v4744_v58, %v1985_v57 }
 0x64f   : > { %v2001_v60 = vsub.f32 2.0, %v1997_v59 }
 0x651   : > { %v2005_v61 = vmul.f32 %v4744_v58, %v2001_v60 }
 0x653   : > { %v5193_v62 = vmul.f32 %v4736_v28, %v2005_v61 }
 0x655   : > { %4547 = vmatmul.mubr.msk.f32.vlgmr.msra.gmra.mxu1 %vm991_vm2, %v5193_v62 }
 0x656   : > { %4555 = vmatpush3.msra.mxu1 %v2245_v56  ;;  %4556 = vmatprep.mubr.msk.f32.mxu1 %vm4800_vm1, %v4799_v12 }
 0x657   : > { %4564 = vmatprep.subr.mxu1 %v4799_v12 }
 0x673   : > { %v1991_v0 = vpop.xlane.xlu1 %1990 }
 0x674   : > { %4745 = vrcp.f32 %v1991_v0 }
 0x677   : > { %v2399_v4 = vpop.permute.xlu1 %2398 }
 0x67b   : > { %v2557_v8 = vpop.permute.xlu1 %2556 }
 0x67f   : > { %v2555_v9 = vpop.permute.xlu1 %2554 }
 0x681   : > { %v4746_v1 = vpop.eup %4745 }
 0x682   : > { %v1999_v2 = vmul.f32 %v4746_v1, %v1991_v0 }
 0x684   : > { %v2003_v3 = vsub.f32 2.0, %v1999_v2 }
 0x686   : > { %v2007_v5 = vmul.f32 %v4746_v1, %v2003_v3 }
 0x688   : > { %v5200_v7 = vmul.f32 %v4738_v32, %v2007_v5 }
 0x68a   : > { %4557 = vmatmul.mubr.msk.f32.vlgmr.msra.gmra.mxu1 %vm991_vm2, %v5200_v7 }
 0x68b   : > { %4565 = vmatpush3.xpose.msk.msra.mxu1 %vm991_vm2, %v2401_v63  ;;  %4566 = vmatprep.mubr.msk.f32.mxu1 %vm4800_vm1, %v4799_v12 }
 0x68c   : > { %4574 = vmatprep.subr.mxu1 %v4799_v12 }
 0x68e   : > { %4567 = vmatmul.mubr.msk.f32.vlgmr.msra.gmra.mxu1 %vm991_vm2, %v2399_v4 }
 0x68f   : > { %4575 = vmatpush3.xpose.msk.msra.mxu1 %vm991_vm2, %v2557_v8  ;;  %4576 = vmatprep.mubr.msk.f32.mxu1 %vm4800_vm1, %v4799_v12 }
 0x690   : > { %4584 = vmatprep.subr.mxu1 %v4799_v12 }
 0x692   : > { %4577 = vmatmul.mubr.msk.f32.vlgmr.msra.gmra.mxu1 %vm991_vm2, %v2555_v9 }
 0x693   : > { %4586 = vmatprep.mubr.msk.f32.mxu1 %vm4800_vm1, %v4799_v12 }
 0x6dd   : > { %v5216_v10 = vpop.f32.mrf.mxu0 }
 0x6df   : > { %v4543_v11 = vpop.f32.mrf.mxu0 }
 0x6e1   : > { %v5218_v14 = vpop.f32.mrf.mxu0 }
 0x6e3   : > { %v4553_v28 = vpop.f32.mrf.mxu0 }
 0x6e5   : > { %v2394_v29 = vpop.f32.mrf.mxu0 }
 0x6e6   : > { %v2632_v30 = vsel %vm991_vm2, %v2394_v29, -inf }
 0x6e7   : > { %2633 = vmax.xlane.f32.xlu0 %v2632_v30  ;;  %v4563_v31 = vpop.f32.mrf.mxu0 }
 0x6e9   : > { %v2550_v32 = vpop.f32.mrf.mxu0 }
 0x6ea   : > { %v2638_v33 = vsel %vm991_vm2, %v2550_v32, -inf }
 0x6eb   : > { %2639 = vmax.xlane.f32.xlu0 %v2638_v33  ;;  %v4573_v34 = vpop.f32.mrf.mxu0 }
 0x715   : > { %v5222_v35 = vpop.f32.mrf.mxu1 }
 0x717   : > { %v4548_v36 = vpop.f32.mrf.mxu1 }
 0x74a   : > { %v5224_v38 = vpop.f32.mrf.mxu1 }
 0x74c   : > { %v4558_v39 = vpop.f32.mrf.mxu1 }
 0x74e   : > { %v2472_v41 = vpop.f32.mrf.mxu1 }
 0x74f   : > { %v2635_v44 = vsel %vm991_vm2, %v2472_v41, -inf }
 0x750   : > { %2636 = vmax.xlane.f32.xlu1 %v2635_v44  ;;  %v4568_v45 = vpop.f32.mrf.mxu1 }
 0x752   : > { %v2628_v46 = vpop.f32.mrf.mxu1 }
 0x753   : > { %v2641_v48 = vsel %vm991_vm2, %v2628_v46, -inf }
 0x754   : > { %v4578_v49 = vpop.f32.mrf.mxu1  ;;  %2642 = vmax.xlane.f32.xlu0 %v2641_v48 }
 0x761   : > { %2764 = vrot.lane.b32.xlu1 %v5036_v23, %s4802_s0 }
 0x765   : > { %2840 = vrot.lane.b32.xlu1 %v5052_v26, %s4802_s0 }
 0x769   : > { %2916 = vrot.lane.b32.xlu1 %v5047_v25, %s4802_s0 }
 0x76a   : > { %2688 = vrot.lane.b32.xlu0 %v5041_v24, %s4802_s0 }
 0x770   : > { %v2634_v50 = vpop.xlane.xlu0 %2633 }
 0x771   : > { %v2644_v51 = vsub.f32 %v2394_v29, %v2634_v50 }
 0x773   : > { %v2648_v54 = vmul.f32 1.442695, %v2644_v51 }
 0x774   : > { %v2640_v55 = vpop.xlane.xlu0 %2639 }
 0x775   : > { %v2646_v56 = vsub.f32 %v2550_v32, %v2640_v55  ;;  %4747 = vpow2.f32 %v2648_v54 }
 0x777   : > { %v2652_v57 = vmul.f32 1.442695, %v2646_v56 }
 0x779   : > { %4749 = vpow2.f32 %v2652_v57 }
 0x782   : > { %v4748_v58 = vpop.eup %4747 }
 0x783   : > { %v2656_v59 = vsel %vm991_vm2, %v4748_v58, 0.0 }
 0x786   : > { %v4750_v60 = vpop.eup %4749 }
 0x787   : > { %v2662_v61 = vsel %vm991_vm2, %v4750_v60, 0.0 }
 0x789   : > { %2657 = vadd.xlane.f32.xlu0 %v2656_v59 }
 0x78d   : > { %2663 = vadd.xlane.f32.xlu0 %v2662_v61 }
 0x7a3   : > { %2994 = vrot.lane.b32.xlu0 %v4998_v20, %s4803_s17 }
 0x7a7   : > { %2992 = vrot.lane.b32.xlu0 %v4990_v16, %s4803_s17 }
 0x7ab   : > { %3150 = vrot.lane.b32.xlu0 %v5005_v22, %s4803_s17 }
 0x7af   : > { %3148 = vrot.lane.b32.xlu0 %v4994_v18, %s4803_s17 }
 0x7d9   : > { %v2637_v63 = vpop.xlane.xlu1 %2636 }
 0x7da   : > { %v2645_v0 = vsub.f32 %v2472_v41, %v2637_v63 }
 0x7dc   : > { %v2650_v1 = vmul.f32 1.442695, %v2645_v0 }
 0x7dd   : > { %v2765_v2 = vpop.permute.xlu1 %2764  ;;  %v2643_v3 = vpop.xlane.xlu0 %2642 }
 0x7de   : > { %4751 = vpow2.f32 %v2650_v1  ;;  %4585 = vmatpush3.msra.mxu1 %v2765_v2  ;;  %v2647_v18 = vsub.f32 %v2628_v46, %v2643_v3 }
 0x7df   : > { %4594 = vmatprep.subr.mxu1 %v4799_v12 }
 0x7e0   : > { %v2654_v22 = vmul.f32 1.442695, %v2647_v18 }
 0x7e1   : > { %v2689_v4 = vpop.permute.xlu0 %2688  ;;  %v2841_v41 = vpop.permute.xlu1 %2840 }
 0x7e2   : > { %4580 = vmatpush3.msra.mxu0 %v2689_v4  ;;  %4753 = vpow2.f32 %v2654_v22 }
 0x7e3   : > { %4589 = vmatprep.subr.mxu0 %v4799_v12 }
 0x7e5   : > { %v2917_v49 = vpop.permute.xlu1 %2916 }
 0x7eb   : > { %v4752_v16 = vpop.eup %4751 }
 0x7ec   : > { %v2659_v20 = vsel %vm991_vm2, %v4752_v16, 0.0 }
 0x7ed   : > { %2660 = vadd.xlane.f32.xlu1 %v2659_v20 }
 0x7ef   : > { %v4754_v9 = vpop.eup %4753 }
 0x7f0   : > { %v2665_v29 = vsel %vm991_vm2, %v4754_v9, 0.0 }
 0x7fe   : > { %3072 = vrot.lane.b32.xlu1 %v4996_v19, %s4803_s17 }
 0x812   : > { %v2658_v5 = vpop.xlane.xlu0 %2657 }
 0x813   : > { %4755 = vrcp.f32 %v2658_v5 }
 0x816   : > { %v2664_v8 = vpop.xlane.xlu0 %2663 }
 0x817   : > { %4757 = vrcp.f32 %v2664_v8 }
 0x81a   : > { %v2995_v30 = vpop.permute.xlu0 %2994 }
 0x81e   : > { %v2993_v39 = vpop.permute.xlu0 %2992 }
 0x820   : > { %v4756_v11 = vpop.eup %4755 }
 0x821   : > { %v2672_v28 = vmul.f32 %v4756_v11, %v2658_v5 }
 0x822   : > { %2666 = vadd.xlane.f32.xlu1 %v2665_v29  ;;  %v3151_v46 = vpop.permute.xlu0 %3150 }
 0x823   : > { %v2676_v31 = vsub.f32 2.0, %v2672_v28 }
 0x824   : > { %v4758_v32 = vpop.eup %4757 }
 0x825   : > { %v2680_v33 = vmul.f32 %v4756_v11, %v2676_v31  ;;  %v2674_v34 = vmul.f32 %v4758_v32, %v2664_v8 }
 0x826   : > { %v3149_v48 = vpop.permute.xlu0 %3148 }
 0x827   : > { %v5252_v36 = vmul.f32 %v4748_v58, %v2680_v33  ;;  %v2678_v19 = vsub.f32 2.0, %v2674_v34 }
 0x829   : > { %v2682_v44 = vmul.f32 %v4758_v32, %v2678_v19  ;;  %4582 = vmatmul.mubr.msk.f32.vlgmr.msra.gmra.mxu0 %vm991_vm2, %v5252_v36 }
 0x82a   : > { %4590 = vmatpush3.msra.mxu0 %v2841_v41  ;;  %4591 = vmatprep.mubr.msk.f32.mxu0 %vm4800_vm1, %v4799_v12 }
 0x82b   : > { %v5258_v45 = vmul.f32 %v4750_v60, %v2682_v44  ;;  %4599 = vmatprep.subr.mxu0 %v4799_v12 }
 0x82d   : > { %4592 = vmatmul.mubr.msk.f32.vlgmr.msra.gmra.mxu0 %vm991_vm2, %v5258_v45 }
 0x82e   : > { %4600 = vmatpush3.xpose.msk.msra.mxu0 %vm991_vm2, %v2995_v30  ;;  %4601 = vmatprep.mubr.msk.f32.mxu0 %vm4800_vm1, %v4799_v12 }
 0x82f   : > { %4609 = vmatprep.subr.mxu0 %v4799_v12 }
 0x831   : > { %4602 = vmatmul.mubr.msk.f32.vlgmr.msra.gmra.mxu0 %vm991_vm2, %v2993_v39 }
 0x832   : > { %4610 = vmatpush3.xpose.msk.msra.mxu0 %vm991_vm2, %v3151_v46  ;;  %4611 = vmatprep.mubr.msk.f32.mxu0 %vm4800_vm1, %v4799_v12 }
 0x833   : > { %3070 = vrot.lane.b32.xlu1 %v4988_v15, %s4803_s17  ;;  %4619 = vmatprep.subr.mxu0 %v4799_v12 }
 0x835   : > { %4612 = vmatmul.mubr.msk.f32.vlgmr.msra.gmra.mxu0 %vm991_vm2, %v3149_v48 }
 0x836   : > { %4621 = vmatprep.mubr.msk.f32.mxu0 %vm4800_vm1, %v4799_v12 }
 0x837   : > { %3228 = vrot.lane.b32.xlu1 %v5002_v21, %s4803_s17 }
 0x83b   : > { %3226 = vrot.lane.b32.xlu1 %v4992_v17, %s4803_s17 }
 0x876   : > { %v2661_v50 = vpop.xlane.xlu1 %2660 }
 0x877   : > { %4759 = vrcp.f32 %v2661_v50 }
 0x87a   : > { %v3073_v21 = vpop.permute.xlu1 %3072 }
 0x884   : > { %v4760_v51 = vpop.eup %4759 }
 0x885   : > { %v2673_v54 = vmul.f32 %v4760_v51, %v2661_v50 }
 0x887   : > { %v2677_v15 = vsub.f32 2.0, %v2673_v54 }
 0x889   : > { %v2681_v55 = vmul.f32 %v4760_v51, %v2677_v15 }
 0x88b   : > { %v5281_v56 = vmul.f32 %v4752_v16, %v2681_v55 }
 0x88d   : > { %4587 = vmatmul.mubr.msk.f32.vlgmr.msra.gmra.mxu1 %vm991_vm2, %v5281_v56 }
 0x88e   : > { %4595 = vmatpush3.msra.mxu1 %v2917_v49  ;;  %4596 = vmatprep.mubr.msk.f32.mxu1 %vm4800_vm1, %v4799_v12 }
 0x88f   : > { %4604 = vmatprep.subr.mxu1 %v4799_v12 }
 0x8ab   : > { %v2667_v17 = vpop.xlane.xlu1 %2666 }
 0x8ac   : > { %4761 = vrcp.f32 %v2667_v17 }
 0x8af   : > { %v3071_v60 = vpop.permute.xlu1 %3070 }
 0x8b3   : > { %v3229_v0 = vpop.permute.xlu1 %3228 }
 0x8b7   : > { %v3227_v1 = vpop.permute.xlu1 %3226 }
 0x8b9   : > { %v4762_v57 = vpop.eup %4761 }
 0x8ba   : > { %v2675_v58 = vmul.f32 %v4762_v57, %v2667_v17 }
 0x8bc   : > { %v2679_v59 = vsub.f32 2.0, %v2675_v58 }
 0x8be   : > { %v2683_v61 = vmul.f32 %v4762_v57, %v2679_v59 }
 0x8c0   : > { %v5288_v63 = vmul.f32 %v4754_v9, %v2683_v61 }
 0x8c2   : > { %4597 = vmatmul.mubr.msk.f32.vlgmr.msra.gmra.mxu1 %vm991_vm2, %v5288_v63 }
 0x8c3   : > { %4605 = vmatpush3.xpose.msk.msra.mxu1 %vm991_vm2, %v3073_v21  ;;  %4606 = vmatprep.mubr.msk.f32.mxu1 %vm4800_vm1, %v4799_v12 }
 0x8c4   : > { %4614 = vmatprep.subr.mxu1 %v4799_v12 }
 0x8c6   : > { %4607 = vmatmul.mubr.msk.f32.vlgmr.msra.gmra.mxu1 %vm991_vm2, %v3071_v60 }
 0x8c7   : > { %4615 = vmatpush3.xpose.msk.msra.mxu1 %vm991_vm2, %v3229_v0  ;;  %4616 = vmatprep.mubr.msk.f32.mxu1 %vm4800_vm1, %v4799_v12 }
 0x8c8   : > { %4624 = vmatprep.subr.mxu1 %v4799_v12 }
 0x8ca   : > { %4617 = vmatmul.mubr.msk.f32.vlgmr.msra.gmra.mxu1 %vm991_vm2, %v3227_v1 }
 0x8cb   : > { %4626 = vmatprep.mubr.msk.f32.mxu1 %vm4800_vm1, %v4799_v12 }
 0x8e9   : > { %v2760_v2 = vpop.f32.mrf.mxu0 }
 0x8eb   : > { %v4583_v3 = vpop.f32.mrf.mxu0 }
 0x8ed   : > { %v2912_v4 = vpop.f32.mrf.mxu0 }
 0x8ef   : > { %v4593_v16 = vpop.f32.mrf.mxu0 }
 0x8f1   : > { %v3066_v20 = vpop.f32.mrf.mxu0 }
 0x8f2   : > { %v3304_v18 = vsel %vm991_vm2, %v3066_v20, -inf }
 0x8f3   : > { %3305 = vmax.xlane.f32.xlu0 %v3304_v18  ;;  %v4603_v22 = vpop.f32.mrf.mxu0 }
 0x8f5   : > { %v3222_v5 = vpop.f32.mrf.mxu0 }
 0x8f6   : > { %v3310_v8 = vsel %vm991_vm2, %v3222_v5, -inf }
 0x8f7   : > { %3311 = vmax.xlane.f32.xlu0 %v3310_v8  ;;  %v4613_v9 = vpop.f32.mrf.mxu0 }
 0x94d   : > { %v5306_v11 = vpop.f32.mrf.mxu1 }
 0x94f   : > { %v4588_v28 = vpop.f32.mrf.mxu1 }
 0x97c   : > { %v3306_v29 = vpop.xlane.xlu0 %3305 }
 0x97d   : > { %v3316_v30 = vsub.f32 %v3066_v20, %v3306_v29 }
 0x97f   : > { %v3320_v31 = vmul.f32 1.442695, %v3316_v30 }
 0x980   : > { %v3312_v32 = vpop.xlane.xlu0 %3311 }
 0x981   : > { %4763 = vpow2.f32 %v3320_v31  ;;  %v3318_v33 = vsub.f32 %v3222_v5, %v3312_v32 }
 0x982   : > { %v2988_v34 = vpop.f32.mrf.mxu1 }
 0x983   : > { %v3324_v19 = vmul.f32 1.442695, %v3318_v33 }
 0x984   : > { %v4598_v39 = vpop.f32.mrf.mxu1 }
 0x985   : > { %4765 = vpow2.f32 %v3324_v19 }
 0x986   : > { %v3144_v41 = vpop.f32.mrf.mxu1 }
 0x987   : > { %v3307_v44 = vsel %vm991_vm2, %v3144_v41, -inf }
 0x988   : > { %3308 = vmax.xlane.f32.xlu1 %v3307_v44  ;;  %v4608_v46 = vpop.f32.mrf.mxu1 }
 0x98a   : > { %v3300_v48 = vpop.f32.mrf.mxu1 }
 0x98b   : > { %v3313_v49 = vsel %vm991_vm2, %v3300_v48, -inf }
 0x98c   : > { %v4618_v50 = vpop.f32.mrf.mxu1  ;;  %3314 = vmax.xlane.f32.xlu0 %v3313_v49 }
 0x98e   : > { %v4764_v51 = vpop.eup %4763 }
 0x98f   : > { %v3328_v54 = vsel %vm991_vm2, %v4764_v51, 0.0 }
 0x990   : > { %3329 = vadd.xlane.f32.xlu0 %v3328_v54 }
 0x992   : > { %v4766_v15 = vpop.eup %4765 }
 0x993   : > { %v3334_v55 = vsel %vm991_vm2, %v4766_v15, 0.0 }
 0x994   : > { %3335 = vadd.xlane.f32.xlu0 %v3334_v55 }
 0x9aa   : > { %3360 = vrot.lane.b32.xlu0 %v5041_v24, %s4803_s17 }
 0x9ae   : > { %3722 = vrot.lane.b32.xlu0 %v5216_v10, %s4804_s18 }
 0x9b2   : > { %3738 = vrot.lane.b32.xlu0 %v2760_v2, %s4805_s19 }
 0x9b6   : > { %3726 = vrot.lane.b32.xlu0 %v5218_v14, %s4804_s18 }
 0x9ba   : > { %3742 = vrot.lane.b32.xlu0 %v2912_v4, %s4805_s19 }
 0xa11   : > { %v3309_v21 = vpop.xlane.xlu1 %3308 }
 0xa12   : > { %v3317_v17 = vsub.f32 %v3144_v41, %v3309_v21 }
 0xa14   : > { %v3322_v57 = vmul.f32 1.442695, %v3317_v17 }
 0xa15   : > { %v3315_v58 = vpop.xlane.xlu0 %3314 }
 0xa16   : > { %4767 = vpow2.f32 %v3322_v57  ;;  %v3319_v4 = vsub.f32 %v3300_v48, %v3315_v58 }
 0xa18   : > { %v3326_v16 = vmul.f32 1.442695, %v3319_v4 }
 0xa19   : > { %v3330_v59 = vpop.xlane.xlu0 %3329 }
 0xa1a   : > { %4769 = vrcp.f32 %v3330_v59 }
 0xa1b   : > { %4771 = vpow2.f32 %v3326_v16  ;;  %v4788_v16 = vld [vmem:[%s4906_s28 + $0x10] sm:$0xff] }
 0xa1d   : > { %v3336_v24 = vpop.xlane.xlu0 %3335 }
 0xa1e   : > { %4773 = vrcp.f32 %v3336_v24 }
 0xa21   : > { %v3361_v60 = vpop.permute.xlu0 %3360 }
 0xa22   : > { %4620 = vmatpush3.msra.mxu0 %v3361_v60 }
 0xa23   : > { %v4768_v61 = vpop.eup %4767  ;;  %4629 = vmatprep.subr.mxu0 %v4799_v12 }
 0xa24   : > { %v3331_v10 = vsel %vm991_vm2, %v4768_v61, 0.0 }
 0xa25   : > { %3332 = vadd.xlane.f32.xlu1 %v3331_v10  ;;  %v3723_v48 = vpop.permute.xlu0 %3722 }
 0xa26   : > { %v3766_v17 = vsel %vm991_vm2, %v5128_v40, %v3723_v48 }
 0xa27   : > { %v4770_v0 = vpop.eup %4769 }
 0xa28   : > { %v3344_v14 = vmul.f32 %v4770_v0, %v3330_v59  ;;  %v4772_v20 = vpop.eup %4771  ;;  %v4787_v59 = vld [vmem:[%s4906_s28] sm:$0xff] }
 0xa29   : > { %v3337_v18 = vsel %vm991_vm2, %v4772_v20, 0.0  ;;  %v3739_v50 = vpop.permute.xlu0 %3738 }
 0xa2a   : > { %v3348_v1 = vsub.f32 2.0, %v3344_v14  ;;  %v3770_v57 = vsel %vm3704_vm3, %v3766_v17, %v3739_v50  ;;  %v3859_v17 = vld [vmem:[%s5587_s10 + $0x18] sm:$0xff] }
 0xa2c   : > { %v3352_v2 = vmul.f32 %v4770_v0, %v3348_v1 }
 0xa2e   : > { %v5322_v3 = vmul.f32 %v4764_v51, %v3352_v2  ;;  %v3727_v51 = vpop.permute.xlu0 %3726 }
 0xa2f   : > { %v3768_v40 = vsel %vm991_vm2, %v5132_v43, %v3727_v51 }
 0xa30   : > { %4622 = vmatmul.mubr.msk.f32.vlgmr.msra.gmra.mxu0 %vm991_vm2, %v5322_v3 }
 0xa31   : > { %4631 = vmatprep.mubr.msk.f32.mxu0 %vm4800_vm1, %v4799_v12 }
 0xa32   : > { %v3743_v55 = vpop.permute.xlu0 %3742 }
 0xa33   : > { %v3772_v1 = vsel %vm3704_vm3, %v3768_v40, %v3743_v55 }
 0xa36   : > { %3436 = vrot.lane.b32.xlu1 %v5036_v23, %s4803_s17  ;;  %v4774_v23 = vpop.eup %4773 }
 0xa3a   : > { %3512 = vrot.lane.b32.xlu1 %v5052_v26, %s4803_s17  ;;  %v3346_v26 = vmul.f32 %v4774_v23, %v3336_v24 }
 0xa3c   : > { %v3350_v22 = vsub.f32 2.0, %v3346_v26 }
 0xa3e   : > { %v3354_v8 = vmul.f32 %v4774_v23, %v3350_v22 }
 0xa5e   : > { %3338 = vadd.xlane.f32.xlu1 %v3337_v18 }
 0xa6f   : > { %3588 = vrot.lane.b32.xlu1 %v5047_v25, %s4803_s17  ;;  %v5343_v25 = vmul.f32 %v4766_v15, %v3354_v8 }
 0xa73   : > { %3724 = vrot.lane.b32.xlu1 %v5222_v35, %s4804_s18 }
 0xa77   : > { %3740 = vrot.lane.b32.xlu1 %v5306_v11, %s4805_s19 }
 0xa7b   : > { %3728 = vrot.lane.b32.xlu1 %v5224_v38, %s4804_s18 }
 0xa7f   : > { %3744 = vrot.lane.b32.xlu1 %v2988_v34, %s4805_s19 }
 0xaae   : > { %v3333_v5 = vpop.xlane.xlu1 %3332 }
 0xaaf   : > { %4775 = vrcp.f32 %v3333_v5 }
 0xab2   : > { %v3437_v9 = vpop.permute.xlu1 %3436 }
 0xab3   : > { %4625 = vmatpush3.msra.mxu1 %v3437_v9  ;;  %v4789_v9 = vld [vmem:[%s4906_s28 + $0x8] sm:$0xff] }
 0xab4   : > { %4634 = vmatprep.subr.mxu1 %v4799_v12 }
 0xab6   : > { %v3513_v35 = vpop.permute.xlu1 %3512 }
 0xab7   : > { %4630 = vmatpush3.msra.mxu0 %v3513_v35 }
 0xab8   : > { %4632 = vmatmul.mubr.msk.f32.vlgmr.msra.gmra.mxu0 %vm991_vm2, %v5343_v25  ;;  %4639 = vmatprep.subr.mxu0 %v3859_v17 }
 0xab9   : > { %4640 = vmatpush3.msra.mxu0 %v3859_v17 }
 0xabc   : > { %v4776_v38 = vpop.eup %4775 }
 0xabd   : > { %v3345_v11 = vmul.f32 %v4776_v38, %v3333_v5 }
 0xabf   : > { %v3349_v28 = vsub.f32 2.0, %v3345_v11 }
 0xac1   : > { %v3353_v29 = vmul.f32 %v4776_v38, %v3349_v28 }
 0xac3   : > { %v5347_v30 = vmul.f32 %v4768_v61, %v3353_v29 }
 0xac5   : > { %4627 = vmatmul.mubr.msk.f32.vlgmr.msra.gmra.mxu1 %vm991_vm2, %v5347_v30 }
 0xac6   : > { %4636 = vmatprep.mubr.msk.f32.mxu1 %vm4800_vm1, %v4799_v12 }
 0xae7   : > { %v3339_v31 = vpop.xlane.xlu1 %3338 }
 0xae8   : > { %4777 = vrcp.f32 %v3339_v31 }
 0xaeb   : > { %v3589_v32 = vpop.permute.xlu1 %3588 }
 0xaec   : > { %4635 = vmatpush3.msra.mxu1 %v3589_v32 }
 0xaef   : > { %v3725_v0 = vpop.permute.xlu1 %3724 }
 0xaf0   : > { %v3432_v33 = vpop.f32.mrf.mxu0  ;;  %v3767_v22 = vsel %vm991_vm2, %v5130_v42, %v3725_v0 }
 0xaf1   : > { %3754 = vrot.lane.b32.xlu0 %v3432_v33, %s4806_s20 }
 0xaf2   : > { %v4623_v34 = vpop.f32.mrf.mxu0 }
 0xaf3   : > { %v3741_v14 = vpop.permute.xlu1 %3740  ;;  %v4790_v34 = vld [vmem:[%s4906_s28 + $0x18] sm:$0xff] }
 0xaf4   : > { %v3771_v43 = vsel %vm3704_vm3, %v3767_v22, %v3741_v14  ;;  %v5442_v14 = vld [vmem:[%s5585_s8] ss:$0 sm:$0xff] }
 0xaf5   : > { %v4778_v19 = vpop.eup %4777  ;;  %v3972_v22 = vld [vmem:[%s5589_s12 + $0x20] sm:$0xff] }
 0xaf6   : > { %v3347_v39 = vmul.f32 %v4778_v19, %v3339_v31 }
 0xaf7   : > { %v3729_v18 = vpop.permute.xlu1 %3728 }
 0xaf8   : > { %v3351_v41 = vsub.f32 2.0, %v3347_v39  ;;  %v3769_v29 = vsel %vm991_vm2, %v5136_v52, %v3729_v18  ;;  %v3975_v18 = vld [vmem:[%s5589_s12 + $0x38] sm:$0xff] }
 0xafa   : > { %v3355_v44 = vmul.f32 %v4778_v19, %v3351_v41 }
 0xafb   : > { %v3745_v26 = vpop.permute.xlu1 %3744 }
 0xafc   : > { %v5354_v46 = vmul.f32 %v4772_v20, %v3355_v44  ;;  %v3773_v31 = vsel %vm3704_vm3, %v3769_v29, %v3745_v26  ;;  %v3973_v26 = vld [vmem:[%s5589_s12 + $0x28] sm:$0xff] }
 0xafe   : > { %4637 = vmatmul.mubr.msk.f32.vlgmr.msra.gmra.mxu1 %vm991_vm2, %v5354_v46 }
 0xb63   : > { %v3755_v21 = vpop.permute.xlu0 %3754 }
 0xb64   : > { %v3774_v58 = vsel %vm3709_vm4, %v3770_v57, %v3755_v21 }
 0xb65   : > { %v5365_v24 = vadd.f32 %v4787_v59, %v3774_v58 }
 0xb67   : > { %v3784_v60 = vsel %vm602_vm0, %v5365_v24, 0.0 }
 0xb78   : > { %v3584_v12 = vpop.f32.mrf.mxu0 }
 0xb79   : > { %3758 = vrot.lane.b32.xlu0 %v3584_v12, %s4806_s20 }
 0xb7a   : > { %v4633_v49 = vpop.f32.mrf.mxu0 }
 0xb85   : > { %v3508_v54 = vpop.f32.mrf.mxu1 }
 0xb86   : > { %3756 = vrot.lane.b32.xlu1 %v3508_v54, %s4806_s20 }
 0xb87   : > { %v4628_v15 = vpop.f32.mrf.mxu1 }
 0xb98   : > { %3785 = vadd.xlane.f32.xlu0 %v3784_v60 }
 0xbbe   : > { %v3660_v61 = vpop.f32.mrf.mxu1 }
 0xbbf   : > { %3760 = vrot.lane.b32.xlu1 %v3660_v61, %s4806_s20 }
 0xbc0   : > { %v4638_v10 = vpop.f32.mrf.mxu1 }
 0xbeb   : > { %v3759_v2 = vpop.permute.xlu0 %3758 }
 0xbec   : > { %v3776_v4 = vsel %vm3709_vm4, %v3772_v1, %v3759_v2  ;;  %v5447_v1 = vld [vmem:[%s5586_s9] ss:$0 sm:$0xff] }
 0xbed   : > { %v5375_v20 = vadd.f32 %v4788_v16, %v3776_v4  ;;  %v3976_v16 = vld [vmem:[%s5589_s12 + $0x40] sm:$0xff] }
 0xbef   : > { %v3790_v23 = vsel %vm602_vm0, %v5375_v20, 0.0 }
 0xbf0   : > { %3791 = vadd.xlane.f32.xlu0 %v3790_v23  ;;  %v3974_v23 = vld [vmem:[%s5589_s12 + $0x30] sm:$0xff] }
 0xbf8   : > { %v3757_v5 = vpop.permute.xlu1 %3756 }
 0xbf9   : > { %v3775_v8 = vsel %vm3709_vm4, %v3771_v43, %v3757_v5 }
 0xbfa   : > { %v5384_v35 = vadd.f32 %v4789_v9, %v3775_v8 }
 0xbfc   : > { %v3787_v38 = vsel %vm602_vm0, %v5384_v35, 0.0 }
 0xbfd   : > { %3788 = vadd.xlane.f32.xlu1 %v3787_v38 }
 0xc21   : > { %v3786_v11 = vpop.xlane.xlu0 %3785 }
 0xc22   : > { %v3796_v28 = vmul.f32 0.03125, %v3786_v11 }
 0xc24   : > { %v3800_v42 = vsub.f32 %v5365_v24, %v3796_v28 }
 0xc26   : > { %v3804_v41 = vmul.f32 %v3800_v42, %v3800_v42 }
 0xc28   : > { %v3808_v44 = vsel %vm602_vm0, %v3804_v41, 0.0 }
 0xc31   : > { %v3761_v32 = vpop.permute.xlu1 %3760 }
 0xc32   : > { %v3777_v33 = vsel %vm3709_vm4, %v3773_v31, %v3761_v32 }
 0xc33   : > { %v5394_v19 = vadd.f32 %v4790_v34, %v3777_v33 }
 0xc35   : > { %v3793_v39 = vsel %vm602_vm0, %v5394_v19, 0.0 }
 0xc36   : > { %3794 = vadd.xlane.f32.xlu0 %v3793_v39 }
 0xc3a   : > { %3809 = vadd.xlane.f32.xlu0 %v3808_v44 }
 0xc79   : > { %v3792_v48 = vpop.xlane.xlu0 %3791 }
 0xc7a   : > { %v3798_v52 = vmul.f32 0.03125, %v3792_v48 }
 0xc7c   : > { %v5400_v12 = vsub.f32 %v5375_v20, %v3798_v52 }
 0xc7e   : > { %v3806_v49 = vmul.f32 %v5400_v12, %v5400_v12 }
 0xc80   : > { %v3814_v50 = vsel %vm602_vm0, %v3806_v49, 0.0 }
 0xc81   : > { %3815 = vadd.xlane.f32.xlu0 %v3814_v50 }
 0xc86   : > { %v3789_v51 = vpop.xlane.xlu1 %3788 }
 0xc87   : > { %v3797_v54 = vmul.f32 0.03125, %v3789_v51 }
 0xc89   : > { %v5406_v15 = vsub.f32 %v5384_v35, %v3797_v54 }
 0xc8b   : > { %v3805_v55 = vmul.f32 %v5406_v15, %v5406_v15 }
 0xc8d   : > { %v3811_v21 = vsel %vm602_vm0, %v3805_v55, 0.0 }
 0xc8e   : > { %3812 = vadd.xlane.f32.xlu1 %v3811_v21 }
 0xc97   : > { %3664 = vrot.lane.b32.xlu0 %v5170_v47, %s4804_s18  ;;  %v3858_v47 = vld [vmem:[%s5587_s10 + $0x10] sm:$0xff] }
 0xc98   : > { %4641 = vmatprep.subr.mxu0 %v3858_v47 }
 0xc99   : > { %4642 = vmatpush3.msra.mxu0 %v3858_v47 }
 0xc9b   : > { %3676 = vrot.lane.b32.xlu0 %v5252_v36, %s4805_s19  ;;  %v3857_v36 = vld [vmem:[%s5587_s10 + $0x8] sm:$0xff] }
 0xc9c   : > { %4643 = vmatprep.subr.mxu0 %v3857_v36 }
 0xc9d   : > { %4644 = vmatpush3.msra.mxu0 %v3857_v36 }
 0xc9f   : > { %3680 = vrot.lane.b32.xlu0 %v5258_v45, %s4805_s19  ;;  %v3856_v45 = vld [vmem:[%s5587_s10] sm:$0xff] }
 0xca0   : > { %4645 = vmatprep.subr.mxu0 %v3856_v45 }
 0xca1   : > { %4646 = vmatpush3.msra.mxu0 %v3856_v45 }
 0xca3   : > { %3688 = vrot.lane.b32.xlu0 %v5322_v3, %s4806_s20 }
 0xca7   : > { %3692 = vrot.lane.b32.xlu0 %v5343_v25, %s4806_s20 }
 0xcbf   : > { %v3795_v3 = vpop.xlane.xlu0 %3794 }
 0xcc0   : > { %v3799_v25 = vmul.f32 0.03125, %v3795_v3 }
 0xcc2   : > { %v5434_v57 = vsub.f32 %v5394_v19, %v3799_v25 }
 0xcc3   : > { %v3810_v58 = vpop.xlane.xlu0 %3809 }
 0xcc4   : > { %v3820_v59 = vmul.f32 0.03125, %v3810_v58  ;;  %v3807_v60 = vmul.f32 %v5434_v57, %v5434_v57 }
 0xcc6   : > { %v3824_v61 = vadd.f32 1e-06, %v3820_v59  ;;  %v3817_v10 = vsel %vm602_vm0, %v3807_v60, 0.0 }
 0xcc7   : > { %3818 = vadd.xlane.f32.xlu1 %v3817_v10 }
 0xcc8   : > { %4779 = vrsqrt.f32 %v3824_v61 }
 0xcd5   : > { %v4780_v0 = vpop.eup %4779 }
 0xcd6   : > { %v3832_v40 = vmul.f32 %v4780_v0, %v3800_v42 }
 0xcd8   : > { %3666 = vrot.lane.b32.xlu1 %v5193_v62, %s4804_s18  ;;  %v3842_v2 = vmul.f32 %v5442_v14, %v3832_v40  ;;  %v3983_v62 = vld [vmem:[%s5589_s12 + $0x78] sm:$0xff] }
 0xcd9   : > { %4653 = vmatprep.subr.mxu1 %v3983_v62 }
 0xcda   : > { %v3852_v4 = vadd.f32 %v5447_v1, %v3842_v2  ;;  %4654 = vmatpush3.msra.mxu1 %v3983_v62  ;;  %v3968_v62 = vld [vmem:[%s5589_s12] sm:$0xff] }
 0xcdc   : > { %3668 = vrot.lane.b32.xlu1 %v5176_v53, %s4804_s18  ;;  %4647 = vmatprep.mubr.msk.f32.mxu0 %vm602_vm0, %v3852_v4  ;;  %v3982_v53 = vld [vmem:[%s5589_s12 + $0x70] sm:$0xff] }
 0xcdd   : > { %4655 = vmatprep.subr.mxu1 %v3982_v53 }
 0xcde   : > { %4656 = vmatpush3.msra.mxu1 %v3982_v53  ;;  %v4313_v53 = vld [vmem:[%s5588_s11] ss:$0 sm:$0xff] }
 0xce0   : > { %3670 = vrot.lane.b32.xlu1 %v5200_v7, %s4804_s18  ;;  %v3981_v7 = vld [vmem:[%s5589_s12 + $0x68] sm:$0xff] }
 0xce1   : > { %4657 = vmatprep.subr.mxu1 %v3981_v7 }
 0xce2   : > { %4658 = vmatpush3.msra.mxu1 %v3981_v7 }
 0xce4   : > { %3678 = vrot.lane.b32.xlu1 %v5281_v56, %s4805_s19  ;;  %v3980_v56 = vld [vmem:[%s5589_s12 + $0x60] sm:$0xff] }
 0xce5   : > { %4659 = vmatprep.subr.mxu1 %v3980_v56 }
 0xce6   : > { %4660 = vmatpush3.msra.mxu1 %v3980_v56 }
 0xce8   : > { %3682 = vrot.lane.b32.xlu1 %v5288_v63, %s4805_s19  ;;  %v3979_v63 = vld [vmem:[%s5589_s12 + $0x58] sm:$0xff] }
 0xce9   : > { %4661 = vmatprep.subr.mxu1 %v3979_v63 }
 0xcea   : > { %4662 = vmatpush3.msra.mxu1 %v3979_v63 }
 0xcec   : > { %3690 = vrot.lane.b32.xlu1 %v5347_v30, %s4806_s20  ;;  %v3978_v30 = vld [vmem:[%s5589_s12 + $0x50] sm:$0xff] }
 0xced   : > { %4663 = vmatprep.subr.mxu1 %v3978_v30 }
 0xcee   : > { %4664 = vmatpush3.msra.mxu1 %v3978_v30 }
 0xcf0   : > { %3694 = vrot.lane.b32.xlu1 %v5354_v46, %s4806_s20  ;;  %v3977_v46 = vld [vmem:[%s5589_s12 + $0x48] sm:$0xff] }
 0xcf1   : > { %4665 = vmatprep.subr.mxu1 %v3977_v46 }
 0xcf2   : > { %4666 = vmatpush3.msra.mxu1 %v3977_v46 }
 0xcf3   : > { %4667 = vmatprep.subr.mxu1 %v3976_v16 }
 0xcf4   : > { %4668 = vmatpush3.msra.mxu1 %v3976_v16 }
 0xcf5   : > { %4669 = vmatprep.subr.mxu1 %v3975_v18 }
 0xcf6   : > { %4670 = vmatpush3.msra.mxu1 %v3975_v18 }
 0xcf7   : > { %4671 = vmatprep.subr.mxu1 %v3974_v23 }
 0xcf8   : > { %4672 = vmatpush3.msra.mxu1 %v3974_v23 }
 0xcf9   : > { %4673 = vmatprep.subr.mxu1 %v3973_v26 }
 0xcfa   : > { %4674 = vmatpush3.msra.mxu1 %v3973_v26 }
 0xcfb   : > { %4675 = vmatprep.subr.mxu1 %v3972_v22 }
 0xcfc   : > { %4676 = vmatpush3.msra.mxu1 %v3972_v22 }
 0xd0a   : > { %v3816_v43 = vpop.xlane.xlu0 %3815 }
 0xd0b   : > { %v3822_v8 = vmul.f32 0.03125, %v3816_v43 }
 0xd0d   : > { %v3826_v38 = vadd.f32 1e-06, %v3822_v8  ;;  %v4318_v8 = vld [vmem:[%s5590_s13] ss:$0 sm:$0xff] }
 0xd0e   : > { %v3665_v5 = vpop.permute.xlu0 %3664 }
 0xd0f   : > { %4781 = vrsqrt.f32 %v3826_v38  ;;  %v3700_v31 = vsel %vm991_vm2, %v5080_v6, %v3665_v5 }
 0xd12   : > { %v3677_v9 = vpop.permute.xlu0 %3676 }
 0xd13   : > { %v3705_v42 = vsel %vm3704_vm3, %v3700_v31, %v3677_v9 }
 0xd16   : > { %v3681_v11 = vpop.permute.xlu0 %3680 }
 0xd17   : > { %v3813_v28 = vpop.xlane.xlu1 %3812 }
 0xd18   : > { %v3821_v29 = vmul.f32 0.03125, %v3813_v28 }
 0xd1a   : > { %v3825_v32 = vadd.f32 1e-06, %v3821_v29  ;;  %v3689_v33 = vpop.permute.xlu0 %3688 }
 0xd1b   : > { %v3710_v34 = vsel %vm3709_vm4, %v3705_v42, %v3689_v33 }
 0xd1c   : > { %4783 = vrsqrt.f32 %v3825_v32  ;;  %3714 = vst.msk [vmem:[%s5508_s23] sm:$0xff] %vm602_vm0, %v3710_v34  ;;  %v4782_v39 = vpop.eup %4781 }
 0xd1d   : > { %v3834_v41 = vmul.f32 %v4782_v39, %v5400_v12 }
 0xd1e   : > { %v3693_v17 = vpop.permute.xlu0 %3692 }
 0xd1f   : > { %v3844_v48 = vmul.f32 %v5442_v14, %v3834_v41 }
 0xd21   : > { %v3854_v50 = vadd.f32 %v5447_v1, %v3844_v48 }
 0xd29   : > { %v4784_v44 = vpop.eup %4783 }
 0xd2a   : > { %v3833_v6 = vmul.f32 %v4784_v44, %v5406_v15 }
 0xd2c   : > { %v3843_v52 = vmul.f32 %v5442_v14, %v3833_v6 }
 0xd2e   : > { %v3853_v49 = vadd.f32 %v5447_v1, %v3843_v52 }
 0xd30   : > { %4648 = vmatmul.mubr.msk.f32.vlgmr.msra.gmra.mxu0 %vm602_vm0, %v3853_v49 }
 0xd31   : > { %4650 = vmatprep.mubr.msk.f32.mxu0 %vm602_vm0, %v3854_v50 }
 0xd50   : > { %v3819_v51 = vpop.xlane.xlu1 %3818 }
 0xd51   : > { %v3823_v54 = vmul.f32 0.03125, %v3819_v51 }
 0xd53   : > { %v3827_v55 = vadd.f32 1e-06, %v3823_v54 }
 0xd54   : > { %v3667_v12 = vpop.permute.xlu1 %3666 }
 0xd55   : > { %4785 = vrsqrt.f32 %v3827_v55 }
 0xd58   : > { %v3669_v21 = vpop.permute.xlu1 %3668 }
 0xd59   : > { %v3702_v15 = vsel %vm991_vm2, %v5090_v27, %v3669_v21  ;;  %v3701_v27 = vsel %vm991_vm2, %v5087_v13, %v3667_v12  ;;  %v3971_v13 = vld [vmem:[%s5589_s12 + $0x18] sm:$0xff] }
 0xd5a   : > { %v3707_v47 = vsel %vm3704_vm3, %v3702_v15, %v3681_v11  ;;  %4677 = vmatprep.subr.mxu1 %v3971_v13 }
 0xd5b   : > { %v3712_v36 = vsel %vm3709_vm4, %v3707_v47, %v3693_v17  ;;  %4678 = vmatpush3.msra.mxu1 %v3971_v13 }
 0xd5c   : > { %3716 = vst.msk [vmem:[%s5508_s23 + $0x10] sm:$0xff] %vm602_vm0, %v3712_v36  ;;  %v3671_v45 = vpop.permute.xlu1 %3670 }
 0xd60   : > { %v3679_v3 = vpop.permute.xlu1 %3678 }
 0xd61   : > { %v3706_v10 = vsel %vm3704_vm3, %v3701_v27, %v3679_v3 }
 0xd62   : > { %v4786_v25 = vpop.eup %4785 }
 0xd63   : > { %v3835_v58 = vmul.f32 %v4786_v25, %v5434_v57  ;;  %v3703_v57 = vsel %vm991_vm2, %v5112_v37, %v3671_v45  ;;  %v3969_v37 = vld [vmem:[%s5589_s12 + $0x8] sm:$0xff] }
 0xd64   : > { %v3683_v59 = vpop.permute.xlu1 %3682 }
 0xd65   : > { %v3845_v60 = vmul.f32 %v5442_v14, %v3835_v58  ;;  %v3708_v2 = vsel %vm3704_vm3, %v3703_v57, %v3683_v59 }
 0xd67   : > { %v3855_v61 = vadd.f32 %v5447_v1, %v3845_v60  ;;  %v3970_v1 = vld [vmem:[%s5589_s12 + $0x10] sm:$0xff] }
 0xd68   : > { %v3691_v0 = vpop.permute.xlu1 %3690  ;;  %4679 = vmatprep.subr.mxu1 %v3970_v1 }
 0xd69   : > { %v3711_v40 = vsel %vm3709_vm4, %v3706_v10, %v3691_v0  ;;  %4651 = vmatmul.mubr.msk.f32.gmra.mxu0 %vm602_vm0, %v3855_v61  ;;  %4680 = vmatpush3.msra.mxu1 %v3970_v1 }
 0xd6a   : > { %3715 = vst.msk [vmem:[%s5508_s23 + $0x8] sm:$0xff] %vm602_vm0, %v3711_v40  ;;  %4681 = vmatprep.subr.mxu1 %v3969_v37 }
 0xd6b   : > { %4682 = vmatpush3.msra.mxu1 %v3969_v37 }
 0xd6c   : > { %v3695_v14 = vpop.permute.xlu1 %3694  ;;  %4683 = vmatprep.subr.mxu1 %v3968_v62 }
 0xd6d   : > { %v3713_v4 = vsel %vm3709_vm4, %v3708_v2, %v3695_v14  ;;  %4684 = vmatpush3.msra.mxu1 %v3968_v62 }
 0xd6e   : > { %3717 = vst.msk [vmem:[%s5508_s23 + $0x18] sm:$0xff] %vm602_vm0, %v3713_v4 }
 0xdf0   : > { %v4649_v7 = vpop.f32.mrf.mxu0 }
 0xdf1   : > { %v3951_v56 = vadd.f32 %v4649_v7, %v4313_v53 }
 0xdf2   : > { %v3945_v63 = vpop.f32.mrf.mxu0 }
 0xdf3   : > { %v3946_v30 = vadd.f32 %v4313_v53, %v3945_v63  ;;  %v3965_v16 = vmax.f32 %v3951_v56, 0.0 }
 0xdf5   : > { %v3964_v46 = vmax.f32 %v3946_v30, 0.0 }
 0xdf7   : > { %4685 = vmatprep.mubr.f32.mxu1 %v3964_v46 }
 0xdf8   : > { %4686 = vmatmul.mubr.f32.vlgmr.msra.gmra.mxu1 %v3965_v16 }
 0xe29   : > { %v4652_v18 = vpop.f32.mrf.mxu0 }
 0xe2a   : > { %v3961_v23 = vadd.f32 %v4652_v18, %v4313_v53 }
 0xe2b   : > { %v3955_v26 = vpop.f32.mrf.mxu0 }
 0xe2c   : > { %v3956_v22 = vadd.f32 %v4313_v53, %v3955_v26  ;;  %v3967_v5 = vmax.f32 %v3961_v23, 0.0 }
 0xe2e   : > { %v3966_v43 = vmax.f32 %v3956_v22, 0.0 }
 0xe30   : > { %4688 = vmatprep.mubr.f32.mxu1 %v3966_v43 }
 0xe31   : > { %4689 = vmatmul.mubr.f32.gmra.mxu1 %v3967_v5 }
 0xeb8   : > { %v4687_v9 = vpop.f32.mrf.mxu1 }
 0xeb9   : > { %v4063_v38 = vadd.f32 %v4687_v9, %v4318_v8 }
 0xeba   : > { %v4057_v11 = vpop.f32.mrf.mxu1 }
 0xebb   : > { %v4077_v28 = vadd.f32 %v4063_v38, %v5384_v35  ;;  %v4058_v29 = vadd.f32 %v4318_v8, %v4057_v11 }
 0xebd   : > { %4081 = vst.msk [vmem:[%s582_s26 + $0x8] sm:$0xff] %vm602_vm0, %v4077_v28  ;;  %v4076_v31 = vadd.f32 %v4058_v29, %v5365_v24 }
 0xebf   : > { %4080 = vst.msk [vmem:[%s582_s26] sm:$0xff] %vm602_vm0, %v4076_v31 }
 0xef1   : > { %v4690_v42 = vpop.f32.mrf.mxu1 }
 0xef2   : > { %v4073_v32 = vadd.f32 %v4690_v42, %v4318_v8 }
 0xef3   : > { %v4067_v33 = vpop.f32.mrf.mxu1 }
 0xef4   : > { %v4079_v34 = vadd.f32 %v4073_v32, %v5394_v19  ;;  %v4068_v39 = vadd.f32 %v4318_v8, %v4067_v33 }
 0xef6   : > { %4083 = vst.msk [vmem:[%s582_s26 + $0x18] sm:$0xff] %vm602_vm0, %v4079_v34  ;;  %v4078_v41 = vadd.f32 %v4068_v39, %v5375_v20 }
 0xef8   : > { %4082 = vst.msk [vmem:[%s582_s26 + $0x10] sm:$0xff] %vm602_vm0, %v4078_v41 }
 0xef9 PF: > { %s27_s21 = sadd.s32 1, %s4797_s21  }
 0xefa   : > { %p24_p4 = scmp.ge.s32.totalorder %s27_s21, 5  }
 0xefc   :  { %26 = sbr.rel (!%p24_p4) target bundleno = 2 (0x2), region = 136 }

</bundles_post_ra>
